<compile_context>
chip_gen: v7x
topology: tpu7x:2x2x1
jax: 0.10.0
libtpu: 0.0.40
codegen_flags: <defaults>
</compile_context>

<pallas_src>
import functools

import jax
import jax.numpy as jnp
from jax import lax
from jax.experimental import pallas as pl
from jax.experimental.pallas import tpu as pltpu


# ----------------------------------------------------------------------------
# Pallas kernel
# ----------------------------------------------------------------------------
def msff_kernel(H, x_ref, b1c_ref, bias1_ref, s_ref, p_ref, pt_ref,
                wa1_ref, ba1_ref, wa1w_ref, ba1w_ref, wh_ref, bh_ref,
                wwb_ref, bww_ref, e_ref, b2ac_ref, bias2a_ref,
                b2bc_ref, bias2b_ref, out_ref):
    M, WC = x_ref.shape            # M = NB * H rows (NB whole images stacked)
    WC2 = out_ref.shape[1]

    def mm(lhs, rhs_ref):
        # Cast LHS to the weight dtype once, accumulate in f32 on the MXU.
        return jnp.dot(lhs.astype(rhs_ref.dtype), rhs_ref[...],
                       preferred_element_type=jnp.float32)

    def hswish(v):
        return v * jnp.clip(v + 3.0, 0.0, 6.0) * (1.0 / 6.0)

    # Per-image row-boundary masks: batch images are stacked along the sublane
    # (M) axis, so the +-1 row rolls must not leak across image boundaries.
    row = lax.broadcasted_iota(jnp.int32, (M, 1), 0) % H
    not_top = (row != 0).astype(jnp.float32)        # zero the r-1 tap on row 0
    not_bot = (row != H - 1).astype(jnp.float32)    # zero the r+1 tap on row H-1

    def fused_conv3x3(lhs, bcat_ref, bias_ref, cout):
        # SAME 3x3 conv as ONE lane-dense matmul against the concatenated
        # banded kernel-row weights, followed by sublane rolls (XLU) + masks.
        ycat = mm(lhs, bcat_ref)                    # (M, 3*cout)
        y0 = ycat[:, 0:cout]                        # kernel row 0 (needs r-1)
        y1 = ycat[:, cout:2 * cout]                 # kernel row 1 (center)
        y2 = ycat[:, 2 * cout:3 * cout]             # kernel row 2 (needs r+1)
        up = pltpu.roll(y0, shift=1, axis=0)        # row r <- y0[r-1]
        dn = pltpu.roll(y2, shift=M - 1, axis=0)    # row r <- y2[r+1]
        return y1 + bias_ref[...] + not_top * up + not_bot * dn

    x = x_ref[...].astype(jnp.float32)              # (M, W*C), lane-dense

    # ---- conv1: 3x3 SAME, C -> C -------------------------------------------
    c1 = fused_conv3x3(x, b1c_ref, bias1_ref, WC)

    # ---- CoordAtt ------------------------------------------------------------
    # Pooling / broadcast matmuls use exact f32 structural matrices (S, P, Pt, E);
    # the learned 1x1 convs use the matmul dtype (bf16 on v6e/v7x).
    ph = jnp.dot(x, s_ref[...], preferred_element_type=jnp.float32)       # (M, C)   mean over W
    pw = jnp.dot(p_ref[...], x, preferred_element_type=jnp.float32)       # (NB, WC) mean over H

    yh = hswish(mm(ph, wa1_ref) + ba1_ref[...])                           # (M, mip)
    ah = jax.nn.sigmoid(mm(yh, wh_ref) + bh_ref[...])                     # (M, C)
    ah_exp = jnp.dot(ah, e_ref[...], preferred_element_type=jnp.float32)  # (M, WC)

    yw = hswish(mm(pw, wa1w_ref) + ba1w_ref[...])                         # (NB, W*mip)
    aw = jax.nn.sigmoid(mm(yw, wwb_ref) + bww_ref[...])                   # (NB, WC)
    aw_rows = jnp.dot(pt_ref[...], aw, preferred_element_type=jnp.float32)  # (M, WC)

    m = c1 * (x * ah_exp * aw_rows)                 # x_conv * x_att  (M, WC)

    # ---- conv2: 3x3 C -> C//2, then 3x3 C//2 -> C//2 -------------------------
    t = fused_conv3x3(m, b2ac_ref, bias2a_ref, WC2)
    o = fused_conv3x3(t, b2bc_ref, bias2b_ref, WC2)

    # TODO(synk): WC2 < 128 at toy channel counts forces masked vst; at real
    # channel counts (W*C//2 >= 128) the store is lane-dense automatically.
    out_ref[...] = o.astype(out_ref.dtype)


# ----------------------------------------------------------------------------
# Wrapper: weight preparation (one-time) + pallas_call
# ----------------------------------------------------------------------------
def _banded_conv_weight_cat(wt, W):
    """HWIO (3,3,Cin,Cout) -> (W*Cin, 3*W*Cout): per-kernel-row banded weights
    (width taps + SAME width zero-padding folded in) concatenated along the
    output axis so each conv is a single matmul."""
    mats = []
    for kh in range(3):
        m = 0
        for kw in range(3):
            m = m + jnp.kron(jnp.eye(W, k=1 - kw, dtype=jnp.float32), wt[kh, kw])
        mats.append(m)
    return jnp.concatenate(mats, axis=-1)


def _pick_group(N, H, target_rows=256):
    """Images per grid step: fold as many images as possible into the matmul M
    dimension (divisor of N, ~target_rows rows)."""
    nb = max(1, min(N, max(1, target_rows // max(H, 1))))
    while N % nb != 0:
        nb -= 1
    if (N // nb) > 1 and (nb * H) % 8 != 0:   # keep sublane dim 8-aligned
        nb = N
    return nb


def msff_block(x_nhwc, p, *, use_bf16_matmul=True):
    N, H, W, C = x_nhwc.shape
    C2 = C // 2
    mip = p['wa1'].shape[1]
    WC, WC2, WM = W * C, W * C2, W * mip
    mm_dtype = jnp.bfloat16 if use_bf16_matmul else jnp.float32

    NB = _pick_group(N, H)                 # images per grid step
    Mstep = NB * H

    # ---- derived, lane-flattened weights (prepared once, outside kernel) -----
    B1c = _banded_conv_weight_cat(p['w1'], W).astype(mm_dtype)     # (WC, 3*WC)
    B2ac = _banded_conv_weight_cat(p['w2a'], W).astype(mm_dtype)   # (WC, 3*WC2)
    B2bc = _banded_conv_weight_cat(p['w2b'], W).astype(mm_dtype)   # (WC2, 3*WC2)
    bias1 = jnp.tile(p['b1'], (1, W))                              # (1, WC)
    bias2a = jnp.tile(p['b2a'], (1, W))                            # (1, WC2)
    bias2b = jnp.tile(p['b2b'], (1, W))                            # (1, WC2)

    eyeC = jnp.eye(C, dtype=jnp.float32)
    S = jnp.tile(eyeC, (W, 1)) / W                                 # (WC, C)  mean over W
    E = jnp.tile(eyeC, (1, W))                                     # (C, WC)  broadcast ah over W
    P = jnp.kron(jnp.eye(NB, dtype=jnp.float32),
                 jnp.ones((1, H), jnp.float32)) / H                # (NB, Mstep)  per-image mean over H
    Pt = jnp.kron(jnp.eye(NB, dtype=jnp.float32),
                  jnp.ones((H, 1), jnp.float32))                   # (Mstep, NB)  broadcast aw to rows
    WA1W = jnp.kron(jnp.eye(W, dtype=jnp.float32),
                    p['wa1']).astype(mm_dtype)                     # (WC, WM) block-diag 1x1 conv
    BA1W = jnp.tile(p['ba1'], (1, W))                              # (1, WM)
    WWB = jnp.kron(jnp.eye(W, dtype=jnp.float32),
                   p['ww']).astype(mm_dtype)                       # (WM, WC) block-diag 1x1 conv
    BWW = jnp.tile(p['bw'], (1, W))                                # (1, WC)
    wa1 = p['wa1'].astype(mm_dtype)
    wh = p['wh'].astype(mm_dtype)

    # Batch folded into the sublane/M axis: (N, H, W, C) -> (N*H, W*C), no pad.
    x_flat = x_nhwc.reshape(N * H, WC)

    weight_args = [B1c, bias1, S, P, Pt, wa1, p['ba1'], WA1W, BA1W,
                   wh, p['bh'], WWB, BWW, E, B2ac, bias2a, B2bc, bias2b]

    in_specs = [pl.BlockSpec((Mstep, WC), lambda g: (g, 0))]
    for wgt in weight_args:
        in_specs.append(pl.BlockSpec(wgt.shape, lambda g, nd=wgt.ndim: (0,) * nd))

    # Explicit VMEM budget: double-buffered I/O blocks + (double-buffered)
    # weights + elementwise temporaries.
    def nbytes(a):
        return int(a.size) * a.dtype.itemsize
    w_bytes = sum(nbytes(w) for w in weight_args)
    io_bytes = 2 * Mstep * (WC + WC2) * x_flat.dtype.itemsize
    tmp_bytes = 4 * Mstep * (3 * WC + 3 * WC2 + 6 * WC)
    est = 2 * w_bytes + io_bytes + tmp_bytes
    vmem_limit = int(min(100 * 1024 * 1024, max(16 * 1024 * 1024, 4 * est)))

    out_flat = pl.pallas_call(
        functools.partial(msff_kernel, H),
        out_shape=jax.ShapeDtypeStruct((N * H, WC2), x_nhwc.dtype),
        grid=(N // NB,),
        in_specs=in_specs,
        out_specs=pl.BlockSpec((Mstep, WC2), lambda g: (g, 0)),
        compiler_params=pltpu.CompilerParams(
            dimension_semantics=("parallel",),
            vmem_limit_bytes=vmem_limit),
    )(x_flat, *weight_args)

    return out_flat.reshape(N, H, W, C2)


# ----------------------------------------------------------------------------
# Deterministic synthetic parameters (PyTorch shapes noted in comments)
# ----------------------------------------------------------------------------
def init_params(key, C):
    C2 = C // 2
    mip = max(8, C // 32)          # CoordAtt default reduction = 32
    ks = jax.random.split(key, 12)

    def w(k, shape, scale):
        return scale * jax.random.normal(k, shape, jnp.float32)

    p = {}
    # conv1: torch (C, C, 3, 3) -> HWIO (3, 3, C, C)
    p['w1'] = w(ks[0], (3, 3, C, C), 0.2)
    p['b1'] = w(ks[1], (1, C), 0.1)

    # CoordAtt conv1 1x1 (mip, C, 1, 1) + BatchNorm2d(mip) eval-mode, folded in.
    gamma = jnp.ones((mip,), jnp.float32)
    beta = jnp.zeros((mip,), jnp.float32)
    rmean = jnp.zeros((mip,), jnp.float32)
    rvar = jnp.ones((mip,), jnp.float32)
    eps = 1e-5
    bn_scale = gamma / jnp.sqrt(rvar + eps)
    bn_shift = beta - rmean * bn_scale
    wa1 = w(ks[2], (C, mip), 0.3)
    ba1 = w(ks[3], (1, mip), 0.1)
    p['wa1'] = wa1 * bn_scale[None, :]
    p['ba1'] = ba1 * bn_scale[None, :] + bn_shift[None, :]

    # CoordAtt conv_h / conv_w 1x1: torch (C, mip, 1, 1) -> (mip, C)
    p['wh'] = w(ks[4], (mip, C), 0.3)
    p['bh'] = w(ks[5], (1, C), 0.1)
    p['ww'] = w(ks[6], (mip, C), 0.3)
    p['bw'] = w(ks[7], (1, C), 0.1)

    # conv2: torch (C//2, C, 3, 3) and (C//2, C//2, 3, 3) -> HWIO
    p['w2a'] = w(ks[8], (3, 3, C, C2), 0.2)
    p['b2a'] = w(ks[9], (1, C2), 0.1)
    p['w2b'] = w(ks[10], (3, 3, C2, C2), 0.2)
    p['b2b'] = w(ks[11], (1, C2), 0.1)
    return p


# ----------------------------------------------------------------------------
# Pure-JAX reference (same math, NHWC) for validation
# ----------------------------------------------------------------------------
def ref_msff(x, p):
    N, H, W, C = x.shape
    dn = ('NHWC', 'HWIO', 'NHWC')
    c1 = lax.conv_general_dilated(x, p['w1'], (1, 1), 'SAME',
                                  dimension_numbers=dn) + p['b1'].reshape(1, 1, 1, -1)
    ph = jnp.mean(x, axis=2)                      # (N, H, C)
    pw = jnp.mean(x, axis=1)                      # (N, W, C)
    y = jnp.concatenate([ph, pw], axis=1)         # (N, H+W, C)
    y = y @ p['wa1'] + p['ba1']
    y = y * jnp.clip(y + 3.0, 0.0, 6.0) / 6.0
    ah = jax.nn.sigmoid(y[:, :H] @ p['wh'] + p['bh'])   # (N, H, C)
    aw = jax.nn.sigmoid(y[:, H:] @ p['ww'] + p['bw'])   # (N, W, C)
    x_att = x * ah[:, :, None, :] * aw[:, None, :, :]
    m = c1 * x_att
    t = lax.conv_general_dilated(m, p['w2a'], (1, 1), 'SAME',
                                 dimension_numbers=dn) + p['b2a'].reshape(1, 1, 1, -1)
    o = lax.conv_general_dilated(t, p['w2b'], (1, 1), 'SAME',
                                 dimension_numbers=dn) + p['b2b'].reshape(1, 1, 1, -1)
    return o


# ----------------------------------------------------------------------------
if __name__ == "__main__":
    key = jax.random.PRNGKey(0)
    k_x, k_p = jax.random.split(key)

    N, C, H, W = 2, 4, 16, 16
    x_nchw = jax.random.normal(k_x, (N, C, H, W), jnp.float32)   # PyTorch layout
    x = jnp.transpose(x_nchw, (0, 2, 3, 1))                      # -> NHWC

    params = init_params(k_p, C)
    ref = ref_msff(x, params)

    # f32 matmul path: tight check against the XLA reference.
    out_f32 = jax.block_until_ready(msff_block(x, params, use_bf16_matmul=False))
    assert out_f32.shape == (N, H, W, C // 2), out_f32.shape
    err_f32 = float(jnp.max(jnp.abs(out_f32 - ref)))
    assert jnp.allclose(out_f32, ref, atol=5e-4, rtol=5e-4), err_f32

    # bf16-operand / f32-accumulate path (default, for v6e/v7x): looser check.
    out_bf16 = jax.block_until_ready(msff_block(x, params, use_bf16_matmul=True))
    assert out_bf16.shape == (N, H, W, C // 2), out_bf16.shape
    scale = float(jnp.max(jnp.abs(ref)))
    err_bf16 = float(jnp.max(jnp.abs(out_bf16 - ref)))
    assert err_bf16 <= 5e-2 * scale, (err_bf16, scale)

    print("KERNEL_OK")
</pallas_src>

<mosaic_0001>
module attributes {stable_mosaic.version = 11 : i64} {
  func.func @msff_kernel(%arg0: i32, %arg1: memref<32x64xf32, #tpu.memory_space<vmem>>, %arg2: memref<64x192xf32, #tpu.memory_space<vmem>>, %arg3: memref<1x64xf32, #tpu.memory_space<vmem>>, %arg4: memref<64x4xf32, #tpu.memory_space<vmem>>, %arg5: memref<2x32xf32, #tpu.memory_space<vmem>>, %arg6: memref<32x2xf32, #tpu.memory_space<vmem>>, %arg7: memref<4x8xf32, #tpu.memory_space<vmem>>, %arg8: memref<1x8xf32, #tpu.memory_space<vmem>>, %arg9: memref<64x128xf32, #tpu.memory_space<vmem>>, %arg10: memref<1x128xf32, #tpu.memory_space<vmem>>, %arg11: memref<8x4xf32, #tpu.memory_space<vmem>>, %arg12: memref<1x4xf32, #tpu.memory_space<vmem>>, %arg13: memref<128x64xf32, #tpu.memory_space<vmem>>, %arg14: memref<1x64xf32, #tpu.memory_space<vmem>>, %arg15: memref<4x64xf32, #tpu.memory_space<vmem>>, %arg16: memref<64x96xf32, #tpu.memory_space<vmem>>, %arg17: memref<1x32xf32, #tpu.memory_space<vmem>>, %arg18: memref<32x96xf32, #tpu.memory_space<vmem>>, %arg19: memref<1x32xf32, #tpu.memory_space<vmem>>, %arg20: memref<32x32xf32, #tpu.memory_space<vmem>>) attributes {dimension_semantics = [#tpu.dimension_semantics<parallel>], iteration_bounds = array<i64: 1>, scalar_prefetch = 0 : i64, scratch_operands = 0 : i64, tpu.core_type = #tpu.core_type<tc>, window_params = [{transform_indices = @transform_0, window_bounds = array<i64: 32, 64>}, {pipeline_mode = #tpu.pipeline_mode<synchronous>, transform_indices = @transform_1, window_bounds = array<i64: 64, 192>}, {pipeline_mode = #tpu.pipeline_mode<synchronous>, transform_indices = @transform_2, window_bounds = array<i64: 1, 64>}, {pipeline_mode = #tpu.pipeline_mode<synchronous>, transform_indices = @transform_3, window_bounds = array<i64: 64, 4>}, {pipeline_mode = #tpu.pipeline_mode<synchronous>, transform_indices = @transform_4, window_bounds = array<i64: 2, 32>}, {pipeline_mode = #tpu.pipeline_mode<synchronous>, transform_indices = @transform_5, window_bounds = array<i64: 32, 2>}, {pipeline_mode = #tpu.pipeline_mode<synchronous>, transform_indices = @transform_6, window_bounds = array<i64: 4, 8>}, {pipeline_mode = #tpu.pipeline_mode<synchronous>, transform_indices = @transform_7, window_bounds = array<i64: 1, 8>}, {pipeline_mode = #tpu.pipeline_mode<synchronous>, transform_indices = @transform_8, window_bounds = array<i64: 64, 128>}, {pipeline_mode = #tpu.pipeline_mode<synchronous>, transform_indices = @transform_9, window_bounds = array<i64: 1, 128>}, {pipeline_mode = #tpu.pipeline_mode<synchronous>, transform_indices = @transform_10, window_bounds = array<i64: 8, 4>}, {pipeline_mode = #tpu.pipeline_mode<synchronous>, transform_indices = @transform_11, window_bounds = array<i64: 1, 4>}, {pipeline_mode = #tpu.pipeline_mode<synchronous>, transform_indices = @transform_12, window_bounds = array<i64: 128, 64>}, {pipeline_mode = #tpu.pipeline_mode<synchronous>, transform_indices = @transform_13, window_bounds = array<i64: 1, 64>}, {pipeline_mode = #tpu.pipeline_mode<synchronous>, transform_indices = @transform_14, window_bounds = array<i64: 4, 64>}, {pipeline_mode = #tpu.pipeline_mode<synchronous>, transform_indices = @transform_15, window_bounds = array<i64: 64, 96>}, {pipeline_mode = #tpu.pipeline_mode<synchronous>, transform_indices = @transform_16, window_bounds = array<i64: 1, 32>}, {pipeline_mode = #tpu.pipeline_mode<synchronous>, transform_indices = @transform_17, window_bounds = array<i64: 32, 96>}, {pipeline_mode = #tpu.pipeline_mode<synchronous>, transform_indices = @transform_18, window_bounds = array<i64: 1, 32>}, {transform_indices = @transform_19, window_bounds = array<i64: 32, 32>}]} {
    %0 = tpu.iota {dimensions = array<i32: 0>} : vector<32x1xi32>
    %c16_i32 = arith.constant 16 : i32
    %c0_i32 = arith.constant 0 : i32
    %1 = arith.cmpi eq, %c16_i32, %c0_i32 : i32
    %c1_i32 = arith.constant 1 : i32
    %2 = arith.select %1, %c1_i32, %c16_i32 : i32
    %3 = vector.broadcast %2 : i32 to vector<32x1xi32>
    %4 = arith.remsi %0, %3 : vector<32x1xi32>
    %c0_i32_0 = arith.constant 0 : i32
    %5 = vector.broadcast %c0_i32_0 : i32 to vector<32x1xi32>
    %6 = arith.cmpi ne, %4, %5 : vector<32x1xi32>
    %c0_i32_1 = arith.constant 0 : i32
    %7 = vector.broadcast %c0_i32_1 : i32 to vector<32x1xi32>
    %8 = arith.cmpi slt, %4, %7 : vector<32x1xi32>
    %c0_i32_2 = arith.constant 0 : i32
    %9 = arith.cmpi slt, %2, %c0_i32_2 : i32
    %10 = vector.broadcast %9 : i1 to vector<32x1xi1>
    %11 = vector.broadcast %10 : vector<32x1xi1> to vector<32x1xi1>
    %12 = arith.xori %8, %11 : vector<32x1xi1>
    %13 = arith.andi %12, %6 : vector<32x1xi1>
    %14 = vector.broadcast %2 : i32 to vector<32x1xi32>
    %15 = arith.addi %4, %14 : vector<32x1xi32>
    %16 = arith.select %13, %15, %4 : vector<32x1xi1>, vector<32x1xi32>
    %c0_i32_3 = arith.constant 0 : i32
    %17 = vector.broadcast %c0_i32_3 : i32 to vector<32x1xi32>
    %18 = arith.cmpi ne, %16, %17 : vector<32x1xi32>
    %19 = arith.extui %18 : vector<32x1xi1> to vector<32x1xi32>
    %20 = arith.sitofp %19 : vector<32x1xi32> to vector<32x1xf32>
    %c15_i32 = arith.constant 15 : i32
    %21 = vector.broadcast %c15_i32 : i32 to vector<32x1xi32>
    %22 = arith.cmpi ne, %16, %21 : vector<32x1xi32>
    %23 = arith.extui %22 : vector<32x1xi1> to vector<32x1xi32>
    %24 = arith.sitofp %23 : vector<32x1xi32> to vector<32x1xf32>
    %c0 = arith.constant 0 : index
    %c0_4 = arith.constant 0 : index
    %25 = vector.load %arg1[%c0, %c0_4] : memref<32x64xf32, #tpu.memory_space<vmem>>, vector<32x64xf32>
    %c0_5 = arith.constant 0 : index
    %c0_6 = arith.constant 0 : index
    %26 = vector.load %arg2[%c0_5, %c0_6] : memref<64x192xf32, #tpu.memory_space<vmem>>, vector<64x192xf32>
    %cst = arith.constant dense<0.000000e+00> : vector<32x192xf32>
    %27 = tpu.matmul %25, %26, %cst {dimension_numbers = #tpu.dot_dimension_numbers<[1], [0], [0], [1], [0, 0, 1, 1], [], []>} : vector<32x64xf32>, vector<64x192xf32>, vector<32x192xf32> -> vector<32x192xf32>
    %28 = vector.extract_strided_slice %27 {offsets = [0, 0], sizes = [32, 64], strides = [1, 1]} : vector<32x192xf32> to vector<32x64xf32>
    %29 = vector.extract_strided_slice %27 {offsets = [0, 64], sizes = [32, 64], strides = [1, 1]} : vector<32x192xf32> to vector<32x64xf32>
    %30 = vector.extract_strided_slice %27 {offsets = [0, 128], sizes = [32, 64], strides = [1, 1]} : vector<32x192xf32> to vector<32x64xf32>
    %c1_i32_7 = arith.constant 1 : i32
    %31 = tpu.dynamic_rotate %28 by %c1_i32_7 dim 0 : vector<32x64xf32>, i32 -> vector<32x64xf32>
    %c31_i32 = arith.constant 31 : i32
    %32 = tpu.dynamic_rotate %30 by %c31_i32 dim 0 : vector<32x64xf32>, i32 -> vector<32x64xf32>
    %c0_8 = arith.constant 0 : index
    %c0_9 = arith.constant 0 : index
    %33 = vector.load %arg3[%c0_8, %c0_9] : memref<1x64xf32, #tpu.memory_space<vmem>>, vector<1x64xf32>
    %34 = vector.broadcast %33 : vector<1x64xf32> to vector<32x64xf32>
    %35 = arith.addf %29, %34 : vector<32x64xf32>
    %36 = vector.broadcast %20 : vector<32x1xf32> to vector<32x64xf32>
    %37 = arith.mulf %36, %31 : vector<32x64xf32>
    %38 = arith.addf %35, %37 : vector<32x64xf32>
    %39 = vector.broadcast %24 : vector<32x1xf32> to vector<32x64xf32>
    %40 = arith.mulf %39, %32 : vector<32x64xf32>
    %41 = arith.addf %38, %40 : vector<32x64xf32>
    %c0_10 = arith.constant 0 : index
    %c0_11 = arith.constant 0 : index
    %42 = vector.load %arg4[%c0_10, %c0_11] : memref<64x4xf32, #tpu.memory_space<vmem>>, vector<64x4xf32>
    %cst_12 = arith.constant dense<0.000000e+00> : vector<32x4xf32>
    %43 = tpu.matmul %25, %42, %cst_12 {dimension_numbers = #tpu.dot_dimension_numbers<[1], [0], [0], [1], [0, 0, 1, 1], [], []>} : vector<32x64xf32>, vector<64x4xf32>, vector<32x4xf32> -> vector<32x4xf32>
    %c0_13 = arith.constant 0 : index
    %c0_14 = arith.constant 0 : index
    %44 = vector.load %arg5[%c0_13, %c0_14] : memref<2x32xf32, #tpu.memory_space<vmem>>, vector<2x32xf32>
    %cst_15 = arith.constant dense<0.000000e+00> : vector<2x64xf32>
    %45 = tpu.matmul %44, %25, %cst_15 {dimension_numbers = #tpu.dot_dimension_numbers<[1], [0], [0], [1], [0, 0, 1, 1], [], []>} : vector<2x32xf32>, vector<32x64xf32>, vector<2x64xf32> -> vector<2x64xf32>
    %c0_16 = arith.constant 0 : index
    %c0_17 = arith.constant 0 : index
    %46 = vector.load %arg7[%c0_16, %c0_17] : memref<4x8xf32, #tpu.memory_space<vmem>>, vector<4x8xf32>
    %cst_18 = arith.constant dense<0.000000e+00> : vector<32x8xf32>
    %47 = tpu.matmul %43, %46, %cst_18 {dimension_numbers = #tpu.dot_dimension_numbers<[1], [0], [0], [1], [0, 0, 1, 1], [], []>} : vector<32x4xf32>, vector<4x8xf32>, vector<32x8xf32> -> vector<32x8xf32>
    %c0_19 = arith.constant 0 : index
    %c0_20 = arith.constant 0 : index
    %48 = vector.load %arg8[%c0_19, %c0_20] : memref<1x8xf32, #tpu.memory_space<vmem>>, vector<1x8xf32>
    %49 = vector.broadcast %48 : vector<1x8xf32> to vector<32x8xf32>
    %50 = arith.addf %47, %49 : vector<32x8xf32>
    %cst_21 = arith.constant 3.000000e+00 : f32
    %51 = vector.broadcast %cst_21 : f32 to vector<32x8xf32>
    %52 = arith.addf %50, %51 : vector<32x8xf32>
    %cst_22 = arith.constant 0.000000e+00 : f32
    %cst_23 = arith.constant 6.000000e+00 : f32
    %53 = vector.broadcast %cst_22 : f32 to vector<32x8xf32>
    %54 = arith.maximumf %53, %52 : vector<32x8xf32>
    %55 = vector.broadcast %cst_23 : f32 to vector<32x8xf32>
    %56 = arith.minimumf %55, %54 : vector<32x8xf32>
    %57 = arith.mulf %50, %56 : vector<32x8xf32>
    %cst_24 = arith.constant 0.166666672 : f32
    %58 = vector.broadcast %cst_24 : f32 to vector<32x8xf32>
    %59 = arith.mulf %57, %58 : vector<32x8xf32>
    %c0_25 = arith.constant 0 : index
    %c0_26 = arith.constant 0 : index
    %60 = vector.load %arg11[%c0_25, %c0_26] : memref<8x4xf32, #tpu.memory_space<vmem>>, vector<8x4xf32>
    %cst_27 = arith.constant dense<0.000000e+00> : vector<32x4xf32>
    %61 = tpu.matmul %59, %60, %cst_27 {dimension_numbers = #tpu.dot_dimension_numbers<[1], [0], [0], [1], [0, 0, 1, 1], [], []>} : vector<32x8xf32>, vector<8x4xf32>, vector<32x4xf32> -> vector<32x4xf32>
    %c0_28 = arith.constant 0 : index
    %c0_29 = arith.constant 0 : index
    %62 = vector.load %arg12[%c0_28, %c0_29] : memref<1x4xf32, #tpu.memory_space<vmem>>, vector<1x4xf32>
    %63 = vector.broadcast %62 : vector<1x4xf32> to vector<32x4xf32>
    %64 = arith.addf %61, %63 : vector<32x4xf32>
    %65 = arith.negf %64 : vector<32x4xf32>
    %66 = math.exp %65 : vector<32x4xf32>
    %cst_30 = arith.constant 1.000000e+00 : f32
    %67 = vector.broadcast %cst_30 : f32 to vector<32x4xf32>
    %68 = arith.addf %67, %66 : vector<32x4xf32>
    %69 = arith.divf %67, %68 : vector<32x4xf32>
    %c0_31 = arith.constant 0 : index
    %c0_32 = arith.constant 0 : index
    %70 = vector.load %arg15[%c0_31, %c0_32] : memref<4x64xf32, #tpu.memory_space<vmem>>, vector<4x64xf32>
    %cst_33 = arith.constant dense<0.000000e+00> : vector<32x64xf32>
    %71 = tpu.matmul %69, %70, %cst_33 {dimension_numbers = #tpu.dot_dimension_numbers<[1], [0], [0], [1], [0, 0, 1, 1], [], []>} : vector<32x4xf32>, vector<4x64xf32>, vector<32x64xf32> -> vector<32x64xf32>
    %c0_34 = arith.constant 0 : index
    %c0_35 = arith.constant 0 : index
    %72 = vector.load %arg9[%c0_34, %c0_35] : memref<64x128xf32, #tpu.memory_space<vmem>>, vector<64x128xf32>
    %cst_36 = arith.constant dense<0.000000e+00> : vector<2x128xf32>
    %73 = tpu.matmul %45, %72, %cst_36 {dimension_numbers = #tpu.dot_dimension_numbers<[1], [0], [0], [1], [0, 0, 1, 1], [], []>} : vector<2x64xf32>, vector<64x128xf32>, vector<2x128xf32> -> vector<2x128xf32>
    %c0_37 = arith.constant 0 : index
    %c0_38 = arith.constant 0 : index
    %74 = vector.load %arg10[%c0_37, %c0_38] : memref<1x128xf32, #tpu.memory_space<vmem>>, vector<1x128xf32>
    %75 = vector.broadcast %74 : vector<1x128xf32> to vector<2x128xf32>
    %76 = arith.addf %73, %75 : vector<2x128xf32>
    %cst_39 = arith.constant 3.000000e+00 : f32
    %77 = vector.broadcast %cst_39 : f32 to vector<2x128xf32>
    %78 = arith.addf %76, %77 : vector<2x128xf32>
    %cst_40 = arith.constant 0.000000e+00 : f32
    %cst_41 = arith.constant 6.000000e+00 : f32
    %79 = vector.broadcast %cst_40 : f32 to vector<2x128xf32>
    %80 = arith.maximumf %79, %78 : vector<2x128xf32>
    %81 = vector.broadcast %cst_41 : f32 to vector<2x128xf32>
    %82 = arith.minimumf %81, %80 : vector<2x128xf32>
    %83 = arith.mulf %76, %82 : vector<2x128xf32>
    %cst_42 = arith.constant 0.166666672 : f32
    %84 = vector.broadcast %cst_42 : f32 to vector<2x128xf32>
    %85 = arith.mulf %83, %84 : vector<2x128xf32>
    %c0_43 = arith.constant 0 : index
    %c0_44 = arith.constant 0 : index
    %86 = vector.load %arg13[%c0_43, %c0_44] : memref<128x64xf32, #tpu.memory_space<vmem>>, vector<128x64xf32>
    %cst_45 = arith.constant dense<0.000000e+00> : vector<2x64xf32>
    %87 = tpu.matmul %85, %86, %cst_45 {dimension_numbers = #tpu.dot_dimension_numbers<[1], [0], [0], [1], [0, 0, 1, 1], [], []>} : vector<2x128xf32>, vector<128x64xf32>, vector<2x64xf32> -> vector<2x64xf32>
    %c0_46 = arith.constant 0 : index
    %c0_47 = arith.constant 0 : index
    %88 = vector.load %arg14[%c0_46, %c0_47] : memref<1x64xf32, #tpu.memory_space<vmem>>, vector<1x64xf32>
    %89 = vector.broadcast %88 : vector<1x64xf32> to vector<2x64xf32>
    %90 = arith.addf %87, %89 : vector<2x64xf32>
    %91 = arith.negf %90 : vector<2x64xf32>
    %92 = math.exp %91 : vector<2x64xf32>
    %cst_48 = arith.constant 1.000000e+00 : f32
    %93 = vector.broadcast %cst_48 : f32 to vector<2x64xf32>
    %94 = arith.addf %93, %92 : vector<2x64xf32>
    %95 = arith.divf %93, %94 : vector<2x64xf32>
    %c0_49 = arith.constant 0 : index
    %c0_50 = arith.constant 0 : index
    %96 = vector.load %arg6[%c0_49, %c0_50] : memref<32x2xf32, #tpu.memory_space<vmem>>, vector<32x2xf32>
    %cst_51 = arith.constant dense<0.000000e+00> : vector<32x64xf32>
    %97 = tpu.matmul %96, %95, %cst_51 {dimension_numbers = #tpu.dot_dimension_numbers<[1], [0], [0], [1], [0, 0, 1, 1], [], []>} : vector<32x2xf32>, vector<2x64xf32>, vector<32x64xf32> -> vector<32x64xf32>
    %98 = arith.mulf %25, %71 : vector<32x64xf32>
    %99 = arith.mulf %98, %97 : vector<32x64xf32>
    %100 = arith.mulf %41, %99 : vector<32x64xf32>
    %c0_52 = arith.constant 0 : index
    %c0_53 = arith.constant 0 : index
    %101 = vector.load %arg16[%c0_52, %c0_53] : memref<64x96xf32, #tpu.memory_space<vmem>>, vector<64x96xf32>
    %cst_54 = arith.constant dense<0.000000e+00> : vector<32x96xf32>
    %102 = tpu.matmul %100, %101, %cst_54 {dimension_numbers = #tpu.dot_dimension_numbers<[1], [0], [0], [1], [0, 0, 1, 1], [], []>} : vector<32x64xf32>, vector<64x96xf32>, vector<32x96xf32> -> vector<32x96xf32>
    %103 = vector.extract_strided_slice %102 {offsets = [0, 0], sizes = [32, 32], strides = [1, 1]} : vector<32x96xf32> to vector<32x32xf32>
    %104 = vector.extract_strided_slice %102 {offsets = [0, 32], sizes = [32, 32], strides = [1, 1]} : vector<32x96xf32> to vector<32x32xf32>
    %105 = vector.extract_strided_slice %102 {offsets = [0, 64], sizes = [32, 32], strides = [1, 1]} : vector<32x96xf32> to vector<32x32xf32>
    %c1_i32_55 = arith.constant 1 : i32
    %106 = tpu.dynamic_rotate %103 by %c1_i32_55 dim 0 : vector<32x32xf32>, i32 -> vector<32x32xf32>
    %c31_i32_56 = arith.constant 31 : i32
    %107 = tpu.dynamic_rotate %105 by %c31_i32_56 dim 0 : vector<32x32xf32>, i32 -> vector<32x32xf32>
    %c0_57 = arith.constant 0 : index
    %c0_58 = arith.constant 0 : index
    %108 = vector.load %arg17[%c0_57, %c0_58] : memref<1x32xf32, #tpu.memory_space<vmem>>, vector<1x32xf32>
    %109 = vector.broadcast %108 : vector<1x32xf32> to vector<32x32xf32>
    %110 = arith.addf %104, %109 : vector<32x32xf32>
    %111 = vector.broadcast %20 : vector<32x1xf32> to vector<32x32xf32>
    %112 = arith.mulf %111, %106 : vector<32x32xf32>
    %113 = arith.addf %110, %112 : vector<32x32xf32>
    %114 = vector.broadcast %24 : vector<32x1xf32> to vector<32x32xf32>
    %115 = arith.mulf %114, %107 : vector<32x32xf32>
    %116 = arith.addf %113, %115 : vector<32x32xf32>
    %c0_59 = arith.constant 0 : index
    %c0_60 = arith.constant 0 : index
    %117 = vector.load %arg18[%c0_59, %c0_60] : memref<32x96xf32, #tpu.memory_space<vmem>>, vector<32x96xf32>
    %cst_61 = arith.constant dense<0.000000e+00> : vector<32x96xf32>
    %118 = tpu.matmul %116, %117, %cst_61 {dimension_numbers = #tpu.dot_dimension_numbers<[1], [0], [0], [1], [0, 0, 1, 1], [], []>} : vector<32x32xf32>, vector<32x96xf32>, vector<32x96xf32> -> vector<32x96xf32>
    %119 = vector.extract_strided_slice %118 {offsets = [0, 0], sizes = [32, 32], strides = [1, 1]} : vector<32x96xf32> to vector<32x32xf32>
    %120 = vector.extract_strided_slice %118 {offsets = [0, 32], sizes = [32, 32], strides = [1, 1]} : vector<32x96xf32> to vector<32x32xf32>
    %121 = vector.extract_strided_slice %118 {offsets = [0, 64], sizes = [32, 32], strides = [1, 1]} : vector<32x96xf32> to vector<32x32xf32>
    %c1_i32_62 = arith.constant 1 : i32
    %122 = tpu.dynamic_rotate %119 by %c1_i32_62 dim 0 : vector<32x32xf32>, i32 -> vector<32x32xf32>
    %c31_i32_63 = arith.constant 31 : i32
    %123 = tpu.dynamic_rotate %121 by %c31_i32_63 dim 0 : vector<32x32xf32>, i32 -> vector<32x32xf32>
    %c0_64 = arith.constant 0 : index
    %c0_65 = arith.constant 0 : index
    %124 = vector.load %arg19[%c0_64, %c0_65] : memref<1x32xf32, #tpu.memory_space<vmem>>, vector<1x32xf32>
    %125 = vector.broadcast %124 : vector<1x32xf32> to vector<32x32xf32>
    %126 = arith.addf %120, %125 : vector<32x32xf32>
    %127 = vector.broadcast %20 : vector<32x1xf32> to vector<32x32xf32>
    %128 = arith.mulf %127, %122 : vector<32x32xf32>
    %129 = arith.addf %126, %128 : vector<32x32xf32>
    %130 = vector.broadcast %24 : vector<32x1xf32> to vector<32x32xf32>
    %131 = arith.mulf %130, %123 : vector<32x32xf32>
    %132 = arith.addf %129, %131 : vector<32x32xf32>
    %c0_66 = arith.constant 0 : index
    %c0_67 = arith.constant 0 : index
    %133 = vector.load %arg20[%c0_66, %c0_67] : memref<32x32xf32, #tpu.memory_space<vmem>>, vector<32x32xf32>
    tpu.vector_store %arg20[%c0_66, %c0_67], %132 {strides = array<i32>} : memref<32x32xf32, #tpu.memory_space<vmem>>, vector<32x32xf32>,
    return
  }
  func.func @transform_0(%arg0: i32) -> (i32, i32) {
    %c0_i32 = arith.constant 0 : i32
    %c0_i32_0 = arith.constant 0 : i32
    return %arg0, %c0_i32 : i32, i32
  }
  func.func @transform_1(%arg0: i32) -> (i32, i32) {
    %c0_i32 = arith.constant 0 : i32
    %c0_i32_0 = arith.constant 0 : i32
    %c0_i32_1 = arith.constant 0 : i32
    return %c0_i32, %c0_i32_0 : i32, i32
  }
  func.func @transform_2(%arg0: i32) -> (i32, i32) {
    %c0_i32 = arith.constant 0 : i32
    %c0_i32_0 = arith.constant 0 : i32
    %c0_i32_1 = arith.constant 0 : i32
    return %c0_i32, %c0_i32_0 : i32, i32
  }
  func.func @transform_3(%arg0: i32) -> (i32, i32) {
    %c0_i32 = arith.constant 0 : i32
    %c0_i32_0 = arith.constant 0 : i32
    %c0_i32_1 = arith.constant 0 : i32
    return %c0_i32, %c0_i32_0 : i32, i32
  }
  func.func @transform_4(%arg0: i32) -> (i32, i32) {
    %c0_i32 = arith.constant 0 : i32
    %c0_i32_0 = arith.constant 0 : i32
    %c0_i32_1 = arith.constant 0 : i32
    return %c0_i32, %c0_i32_0 : i32, i32
  }
  func.func @transform_5(%arg0: i32) -> (i32, i32) {
    %c0_i32 = arith.constant 0 : i32
    %c0_i32_0 = arith.constant 0 : i32
    %c0_i32_1 = arith.constant 0 : i32
    return %c0_i32, %c0_i32_0 : i32, i32
  }
  func.func @transform_6(%arg0: i32) -> (i32, i32) {
    %c0_i32 = arith.constant 0 : i32
    %c0_i32_0 = arith.constant 0 : i32
    %c0_i32_1 = arith.constant 0 : i32
    return %c0_i32, %c0_i32_0 : i32, i32
  }
  func.func @transform_7(%arg0: i32) -> (i32, i32) {
    %c0_i32 = arith.constant 0 : i32
    %c0_i32_0 = arith.constant 0 : i32
    %c0_i32_1 = arith.constant 0 : i32
    return %c0_i32, %c0_i32_0 : i32, i32
  }
  func.func @transform_8(%arg0: i32) -> (i32, i32) {
    %c0_i32 = arith.constant 0 : i32
    %c0_i32_0 = arith.constant 0 : i32
    %c0_i32_1 = arith.constant 0 : i32
    return %c0_i32, %c0_i32_0 : i32, i32
  }
  func.func @transform_9(%arg0: i32) -> (i32, i32) {
    %c0_i32 = arith.constant 0 : i32
    %c0_i32_0 = arith.constant 0 : i32
    %c0_i32_1 = arith.constant 0 : i32
    return %c0_i32, %c0_i32_0 : i32, i32
  }
  func.func @transform_10(%arg0: i32) -> (i32, i32) {
    %c0_i32 = arith.constant 0 : i32
    %c0_i32_0 = arith.constant 0 : i32
    %c0_i32_1 = arith.constant 0 : i32
    return %c0_i32, %c0_i32_0 : i32, i32
  }
  func.func @transform_11(%arg0: i32) -> (i32, i32) {
    %c0_i32 = arith.constant 0 : i32
    %c0_i32_0 = arith.constant 0 : i32
    %c0_i32_1 = arith.constant 0 : i32
    return %c0_i32, %c0_i32_0 : i32, i32
  }
  func.func @transform_12(%arg0: i32) -> (i32, i32) {
    %c0_i32 = arith.constant 0 : i32
    %c0_i32_0 = arith.constant 0 : i32
    %c0_i32_1 = arith.constant 0 : i32
    return %c0_i32, %c0_i32_0 : i32, i32
  }
  func.func @transform_13(%arg0: i32) -> (i32, i32) {
    %c0_i32 = arith.constant 0 : i32
    %c0_i32_0 = arith.constant 0 : i32
    %c0_i32_1 = arith.constant 0 : i32
    return %c0_i32, %c0_i32_0 : i32, i32
  }
  func.func @transform_14(%arg0: i32) -> (i32, i32) {
    %c0_i32 = arith.constant 0 : i32
    %c0_i32_0 = arith.constant 0 : i32
    %c0_i32_1 = arith.constant 0 : i32
    return %c0_i32, %c0_i32_0 : i32, i32
  }
  func.func @transform_15(%arg0: i32) -> (i32, i32) {
    %c0_i32 = arith.constant 0 : i32
    %c0_i32_0 = arith.constant 0 : i32
    %c0_i32_1 = arith.constant 0 : i32
    return %c0_i32, %c0_i32_0 : i32, i32
  }
  func.func @transform_16(%arg0: i32) -> (i32, i32) {
    %c0_i32 = arith.constant 0 : i32
    %c0_i32_0 = arith.constant 0 : i32
    %c0_i32_1 = arith.constant 0 : i32
    return %c0_i32, %c0_i32_0 : i32, i32
  }
  func.func @transform_17(%arg0: i32) -> (i32, i32) {
    %c0_i32 = arith.constant 0 : i32
    %c0_i32_0 = arith.constant 0 : i32
    %c0_i32_1 = arith.constant 0 : i32
    return %c0_i32, %c0_i32_0 : i32, i32
  }
  func.func @transform_18(%arg0: i32) -> (i32, i32) {
    %c0_i32 = arith.constant 0 : i32
    %c0_i32_0 = arith.constant 0 : i32
    %c0_i32_1 = arith.constant 0 : i32
    return %c0_i32, %c0_i32_0 : i32, i32
  }
  func.func @transform_19(%arg0: i32) -> (i32, i32) {
    %c0_i32 = arith.constant 0 : i32
    %c0_i32_0 = arith.constant 0 : i32
    return %arg0, %c0_i32 : i32, i32
  }
}

</mosaic_0001>

<bundles_post_ra>
// kernel: tpu_custom_call.1
= control target key start
LH: loop header
LB: loop body
LE: loop exit
PB: predicated region body
PF: predicated region fallthrough
CT: control target
= control target key end

     0   :  { %s3020_s0 = inlined_call_operand.hbm [shape: f32[32,64], index: 0, kind: input, shape index: {}]   ;;  %s3021_s1 = inlined_call_operand.vmem [shape: f32[64,192], index: 1, kind: input, shape index: {}]   ;;  %s3022_s2 = inlined_call_operand.vmem [shape: f32[1,64], index: 2, kind: input, shape index: {}]   ;;  %s3023_s3 = inlined_call_operand.vmem [shape: f32[64,4], index: 3, kind: input, shape index: {}]   ;;  %s3024_s4 = inlined_call_operand.hbm [shape: f32[2,32], index: 4, kind: input, shape index: {}]   ;;  %s3025_s5 = inlined_call_operand.vmem [shape: f32[32,2], index: 5, kind: input, shape index: {}]   ;;  %s3026_s6 = inlined_call_operand.hbm [shape: f32[4,8], index: 6, kind: input, shape index: {}]   ;;  %s3027_s7 = inlined_call_operand.hbm [shape: f32[1,8], index: 7, kind: input, shape index: {}]   ;;  %s3028_s8 = inlined_call_operand.vmem [shape: f32[64,128], index: 8, kind: input, shape index: {}]   ;;  %s3029_s9 = inlined_call_operand.hbm [shape: f32[1,128], index: 9, kind: input, shape index: {}]   ;;  %s3030_s10 = inlined_call_operand.vmem [shape: f32[8,4], index: 10, kind: input, shape index: {}]   ;;  %s3031_s11 = inlined_call_operand.hbm [shape: f32[1,4], index: 11, kind: input, shape index: {}]   ;;  %s3032_s12 = inlined_call_operand.vmem [shape: f32[128,64], index: 12, kind: input, shape index: {}]   ;;  %s3033_s13 = inlined_call_operand.hbm [shape: f32[1,64], index: 13, kind: input, shape index: {}]   ;;  %s3034_s14 = inlined_call_operand.vmem [shape: f32[4,64], index: 14, kind: input, shape index: {}]   ;;  %s3035_s15 = inlined_call_operand.vmem [shape: f32[64,96], index: 15, kind: input, shape index: {}]   ;;  %s3036_s16 = inlined_call_operand.vmem [shape: f32[1,32], index: 16, kind: input, shape index: {}]   ;;  %s3037_s17 = inlined_call_operand.vmem [shape: f32[32,96], index: 17, kind: input, shape index: {}]   ;;  %s3038_s18 = inlined_call_operand.vmem [shape: f32[1,32], index: 18, kind: input, shape index: {}]   ;;  %s3039_s19 = inlined_call_operand.hbm [shape: f32[32,32], index: 19, kind: output, shape index: {}]  }
   0x1   :  { %3043 = sst [smem:[#allocation20_spill]] %s3020_s0 }
   0x2   :  { %3044 = sst [smem:[#allocation21_spill]] %s3021_s1 }
   0x3   :  { %3045 = sst [smem:[#allocation22_spill]] %s3022_s2 }
   0x4   :  { %3046 = sst [smem:[#allocation23_spill]] %s3023_s3 }
   0x5   :  { %24 = vsyncpa [#allocation3], 0 }
   0x6   :  { %25 = vsyncpa [#allocation6], 0 }
   0x7   :  { %26 = vsyncpa [#allocation9], 0 }
   0x8   :  { %27 = vsyncpa [#allocation12], 0 }
   0x9   :  { %28 = vsyncpa [#allocation4], 0  ;;  %s2338_s0 = smov [#allocation5]   ;;  %s2339_s20 = smov [#allocation8]  }
   0xa   :  { %s53_s30 = sshll.u32 %s2338_s0, 4  ;;  %s75_s21 = sshll.u32 %s2339_s20, 4  ;;  %s54_s30 = int_to_ptr.vmem [resolvable:$true] %s53_s30  ;;  %s76_s21 = int_to_ptr.vmem [resolvable:$true] %s75_s21 }
   0xb   :  { %s2152_s2 = scalar_lea.hbm %s3024_s4, 32 }
   0xc   :  { %p2153_p0 = scmp.ne.s32.totalorder %s3024_s4, %s2152_s2  ;;  %p2156_p1 = scmp.lt.u32.totalorder %s2152_s2, %s3024_s4 }
   0xe   :  { %p2158_p2 = pnand %p2156_p1, %p2153_p0 }
  0x10   :  { %2161 = shalt.err (!%p2158_p2)
}
  0x11   :  { %s2162_s26 = scalar_lea.vmem %s54_s30, 32  ;;  %p2167_p4 = scmp.lt.s32.totalorder %s54_s30, %s54_s30 }
  0x12   :  { %p2163_p3 = scmp.ne.s32.totalorder %s54_s30, %s2162_s26  ;;  %p2168_p5 = scmp.lt.s32.totalorder %s2162_s26, %s2162_s26 }
  0x14   :  { %p2169_p6 = por %p2168_p5, %p2167_p4 }
  0x16   :  { %p2170_p7 = pnand %p2169_p6, %p2163_p3 }
  0x18   :  { %2173 = shalt.err (!%p2170_p7)
}
  0x19   :  { %56 = dma.hbm_to_vmem [thread:$0]  %s3024_s4, 32, %s54_s30, [#allocation6]  }
  0x1a   :  { %s2174_s20 = scalar_lea.hbm %s3027_s7, 16 }
  0x1b   :  { %p2175_p8 = scmp.ne.s32.totalorder %s3027_s7, %s2174_s20  ;;  %p2178_p9 = scmp.lt.u32.totalorder %s2174_s20, %s3027_s7 }
  0x1d   :  { %p2180_p10 = pnand %p2178_p9, %p2175_p8 }
  0x1f   :  { %2183 = shalt.err (!%p2180_p10)
}
  0x20   :  { %s2184_s24 = scalar_lea.vmem %s76_s21, 16  ;;  %s2188_s25 = scalar_lea.vmem %s76_s21, 32 }
  0x21   :  { %p2185_p11 = scmp.ne.s32.totalorder %s76_s21, %s2184_s24  ;;  %p2189_p12 = scmp.lt.s32.totalorder %s76_s21, %s76_s21 }
  0x22   :  { %p2190_p13 = scmp.lt.s32.totalorder %s2188_s25, %s2184_s24 }
  0x24   :  { %p2191_p0 = por %p2190_p13, %p2189_p12 }
  0x26   :  { %p2192_p1 = pnand %p2191_p0, %p2185_p11 }
  0x28   :  { %2195 = shalt.err (!%p2192_p1)
}
  0x29   :  { %78 = dma.hbm_to_vmem [thread:$0]  %s3027_s7, 16, %s76_s21, [#allocation9]  }
  0x2a   :  { %s2340_s3 = smov [#allocation11]   ;;  %s2341_s27 = smov [#allocation2]  }
  0x2b   :  { %s99_s26 = sshll.u32 %s2340_s3, 4  ;;  %s34_s28 = sshll.u32 %s2341_s27, 4  ;;  %s100_s26 = int_to_ptr.vmem [resolvable:$true] %s99_s26  ;;  %s2478_s28 = int_to_ptr.vmem [resolvable:$true] %s34_s28 }
  0x2c   :  { %s2196_s20 = scalar_lea.hbm %s3031_s11, 16 }
  0x2d   :  { %p2197_p2 = scmp.ne.s32.totalorder %s3031_s11, %s2196_s20  ;;  %p2200_p3 = scmp.lt.u32.totalorder %s2196_s20, %s3031_s11 }
  0x2f   :  { %p2202_p4 = pnand %p2200_p3, %p2197_p2 }
  0x31   :  { %2205 = shalt.err (!%p2202_p4)
}
  0x32   :  { %s2206_s7 = scalar_lea.vmem %s100_s26, 16  ;;  %s2210_s21 = scalar_lea.vmem %s100_s26, 32 }
  0x33   :  { %p2207_p5 = scmp.ne.s32.totalorder %s100_s26, %s2206_s7  ;;  %p2211_p6 = scmp.lt.s32.totalorder %s100_s26, %s100_s26 }
  0x34   :  { %p2212_p7 = scmp.lt.s32.totalorder %s2210_s21, %s2206_s7 }
  0x36   :  { %p2213_p8 = por %p2212_p7, %p2211_p6 }
  0x38   :  { %p2214_p9 = pnand %p2213_p8, %p2207_p5 }
  0x3a   :  { %2217 = shalt.err (!%p2214_p9)
}
  0x3b   :  { %102 = dma.hbm_to_vmem [thread:$0]  %s3031_s11, 16, %s100_s26, [#allocation12]  }
  0x3c   :  { %s3047_s3 = sld [smem:[#allocation20_spill]] }
  0x42   :  { %s2218_s27 = scalar_lea.hbm %s3047_s3, 512 }
  0x43   :  { %p2219_p10 = scmp.ne.s32.totalorder %s3047_s3, %s2218_s27  ;;  %p2222_p11 = scmp.lt.u32.totalorder %s2218_s27, %s3047_s3 }
  0x45   :  { %p2224_p12 = pnand %p2222_p11, %p2219_p10 }
  0x47   :  { %2227 = shalt.err (!%p2224_p12)
}
  0x48   :  { %s2228_s22 = scalar_lea.vmem %s2478_s28, 512  ;;  %p2233_p0 = scmp.lt.s32.totalorder %s2478_s28, %s2478_s28 }
  0x49   :  { %p2229_p13 = scmp.ne.s32.totalorder %s2478_s28, %s2228_s22  ;;  %p2234_p1 = scmp.lt.s32.totalorder %s2228_s22, %s2228_s22 }
  0x4b   :  { %p2235_p2 = por %p2234_p1, %p2233_p0 }
  0x4d   :  { %p2236_p3 = pnand %p2235_p2, %p2229_p13 }
  0x4f   :  { %2239 = shalt.err (!%p2236_p3)
}
  0x50   :  { %s2342_s11 = smov 128   ;;  %s2343_s26 = smov 8  }
  0x51   :  { %40 = dma.hbm_to_vmem [thread:$0]  %s3047_s3, 512, %s2478_s28, [#allocation3], %s2342_s11, %s2342_s11, %s2343_s26  }
  0x52   :  { %s2344_s7 = smov [#allocation7]   ;;  %s2345_s24 = smov [#allocation10]  }
  0x53   :  { %s65_s21 = sshll.u32 %s2344_s7, 4  ;;  %s87_s25 = sshll.u32 %s2345_s24, 4  ;;  %s66_s21 = int_to_ptr.vmem [resolvable:$true] %s65_s21  ;;  %s88_s25 = int_to_ptr.vmem [resolvable:$true] %s87_s25 }
  0x54   :  { %s2240_s27 = scalar_lea.hbm %s3026_s6, 64 }
  0x55   :  { %p2241_p4 = scmp.ne.s32.totalorder %s3026_s6, %s2240_s27  ;;  %p2244_p5 = scmp.lt.u32.totalorder %s2240_s27, %s3026_s6 }
  0x57   :  { %p2246_p6 = pnand %p2244_p5, %p2241_p4 }
  0x59   :  { %2249 = shalt.err (!%p2246_p6)
}
  0x5a   :  { %s2250_s28 = scalar_lea.vmem %s66_s21, 64  ;;  %p2255_p8 = scmp.lt.s32.totalorder %s66_s21, %s66_s21 }
  0x5b   :  { %p2251_p7 = scmp.ne.s32.totalorder %s66_s21, %s2250_s28  ;;  %p2256_p9 = scmp.lt.s32.totalorder %s2250_s28, %s2250_s28 }
  0x5d   :  { %p2257_p10 = por %p2256_p9, %p2255_p8 }
  0x5f   :  { %p2258_p11 = pnand %p2257_p10, %p2251_p7 }
  0x61   :  { %2261 = shalt.err (!%p2258_p11)
}
  0x62   :  { %68 = dma.hbm_to_vmem [thread:$0]  %s3026_s6, 64, %s66_s21, [#allocation6]  }
  0x63   :  { %s2262_s7 = scalar_lea.hbm %s3029_s9, 16 }
  0x64   :  { %p2263_p12 = scmp.ne.s32.totalorder %s3029_s9, %s2262_s7  ;;  %p2266_p13 = scmp.lt.u32.totalorder %s2262_s7, %s3029_s9 }
  0x66   :  { %p2268_p0 = pnand %p2266_p13, %p2263_p12 }
  0x68   :  { %2271 = shalt.err (!%p2268_p0)
}
  0x69   :  { %s2272_s29 = scalar_lea.vmem %s88_s25, 16  ;;  %s2276_s0 = scalar_lea.vmem %s88_s25, 32 }
  0x6a   :  { %p2273_p1 = scmp.ne.s32.totalorder %s88_s25, %s2272_s29  ;;  %p2277_p2 = scmp.lt.s32.totalorder %s88_s25, %s88_s25 }
  0x6b   :  { %p2278_p3 = scmp.lt.s32.totalorder %s2276_s0, %s2272_s29 }
  0x6d   :  { %p2279_p4 = por %p2278_p3, %p2277_p2 }
  0x6f   :  { %p2280_p5 = pnand %p2279_p4, %p2273_p1 }
  0x71   :  { %2283 = shalt.err (!%p2280_p5)
}
  0x72   :  { %90 = dma.hbm_to_vmem [thread:$0]  %s3029_s9, 16, %s88_s25, [#allocation9]  }
  0x73   :  { %s2346_s20 = smov [#allocation13]   ;;  %s2284_s22 = scalar_lea.hbm %s3033_s13, 16 }
  0x74   :  { %s111_s1 = sshll.u32 %s2346_s20, 4  ;;  %p2285_p6 = scmp.ne.s32.totalorder %s3033_s13, %s2284_s22  ;;  %s112_s1 = int_to_ptr.vmem [resolvable:$true] %s111_s1 }
  0x75   :  { %p2288_p7 = scmp.lt.u32.totalorder %s2284_s22, %s3033_s13 }
  0x77   :  { %p2290_p8 = pnand %p2288_p7, %p2285_p6 }
  0x79   :  { %2293 = shalt.err (!%p2290_p8)
}
  0x7a   :  { %s2294_s4 = scalar_lea.vmem %s112_s1, 16  ;;  %s2298_s9 = scalar_lea.vmem %s112_s1, 32 }
  0x7b   :  { %p2295_p9 = scmp.ne.s32.totalorder %s112_s1, %s2294_s4  ;;  %p2299_p10 = scmp.lt.s32.totalorder %s112_s1, %s112_s1 }
  0x7c   :  { %p2300_p11 = scmp.lt.s32.totalorder %s2298_s9, %s2294_s4 }
  0x7e   :  { %p2301_p12 = por %p2300_p11, %p2299_p10 }
  0x80   :  { %p2302_p13 = pnand %p2301_p12, %p2295_p9 }
  0x82   :  { %2305 = shalt.err (!%p2302_p13)
}
  0x83   :  { %114 = dma.hbm_to_vmem [thread:$0]  %s3033_s13, 16, %s112_s1, [#allocation12]  }
  0x84   :  { %2328 = dma.done.wait [#allocation3], 512  }
  0x85   :  { %2329 = vsyncadd [#allocation3], 4294966784 }
  0x86   :  { %2330 = dma.done.wait [#allocation6], 96  }
  0x87   :  { %2331 = vsyncadd [#allocation6], 4294967200 }
  0x88   :  { %2332 = dma.done.wait [#allocation9], 32  }
  0x89   :  { %2333 = vsyncadd [#allocation9], 4294967264 }
  0x8a   :  { %2334 = dma.done.wait [#allocation12], 32  }
  0x8b   :  { %2335 = vsyncadd [#allocation12], 4294967264  ;;  %v2347_v0 = vmov 0.0   ;;  %s3048_s0 = sld [smem:[#allocation23_spill]]  ;;  %vm243_vm0 = vcmask 523264   ;;  %v2567_v9 = vld [vmem:[#allocation2] sm:$0xff] }
  0x8c   :  { %320 = vmatprep.mubr.f32.mxu0 %v2347_v0  ;;  %1879 = vmatprep.mubr.msk.f32.mxu1 %vm243_vm0, %v2567_v9  ;;  %v2577_v14 = vld [vmem:[#allocation2 + $0x8] sm:$0xff]  ;;  %v2581_v16 = vld [vmem:[#allocation2 + $0x10] sm:$0xff]  ;;  %v2348_v17 = vmov 0.0|0.0   ;;  %v2586_v18 = vld [vmem:[#allocation2 + $0x18] sm:$0xff]  ;;  %vm2349_vm1 = vmmov 0   ;;  %vm518_vm2 = vcmask 261120  }
  0x8d   :  { %v2051_v15 = vpack.c.bf16 %v2577_v14, %v2567_v9  ;;  %v2054_v19 = vpack.c.bf16 %v2586_v18, %v2581_v16  ;;  %v517_v20 = vld [vmem:[#allocation5] sm:$0x3]  ;;  %v592_v21 = vld [vmem:[#allocation7] sm:$0xf]  ;;  %vm613_vm3 = vcmask 1043456   ;;  %s3049_s27 = sld [smem:[#allocation21_spill]] }
  0x8e   :  { %v953_v46 = vld [vmem:[%s3028_s8] sm:$0xff]  ;;  %v954_v47 = vld [vmem:[%s3028_s8 + $0x8] sm:$0xff]  ;;  %v955_v49 = vld [vmem:[%s3028_s8 + $0x10] sm:$0xff]  ;;  %vm600_vm4 = vcmask 31744   ;;  %s3050_s7 = sld [smem:[#allocation22_spill]]  ;;  %s2350_s24 = smov 64  }
  0x8f   :  { %v2057_v48 = vpack.c.bf16 %v954_v47, %v953_v46  ;;  %v956_v50 = vld [vmem:[%s3028_s8 + $0x18] sm:$0xff]  ;;  %v957_v52 = vld [vmem:[%s3028_s8 + $0x20] sm:$0xff]  ;;  %v958_v53 = vld [vmem:[%s3028_s8 + $0x28] sm:$0xff]  ;;  %vm730_vm10 = vcmask 64512   ;;  %vm1149_vm11 = vcmask 15360   ;;  %vm1162_vm12 = vcmask 1041408  }
  0x90   :  { %v2060_v51 = vpack.c.bf16 %v956_v50, %v955_v49  ;;  %v2063_v54 = vpack.c.bf16 %v958_v53, %v957_v52  ;;  %v959_v55 = vld [vmem:[%s3028_s8 + $0x30] sm:$0xff]  ;;  %v960_v56 = vld [vmem:[%s3028_s8 + $0x38] sm:$0xff] }
  0x91   :  { %v424_v1 = vld [vmem:[%s3048_s0] sm:$0xff]  ;;  %v425_v2 = vld [vmem:[%s3048_s0 + $0x8] sm:$0xff]  ;;  %v426_v3 = vld [vmem:[%s3048_s0 + $0x10] sm:$0xff]  ;;  %v2066_v57 = vpack.c.bf16 %v960_v56, %v959_v55 }
  0x92   :  { %v2034_v4 = vpack.c.bf16 %v425_v2, %v424_v1  ;;  %v427_v5 = vld [vmem:[%s3048_s0 + $0x18] sm:$0xff]  ;;  %v428_v7 = vld [vmem:[%s3048_s0 + $0x20] sm:$0xff]  ;;  %v429_v8 = vld [vmem:[%s3048_s0 + $0x28] sm:$0xff] }
  0x93   :  { %v2038_v6 = vpack.c.bf16 %v427_v5, %v426_v3  ;;  %v2042_v10 = vpack.c.bf16 %v429_v8, %v428_v7  ;;  %v430_v11 = vld [vmem:[%s3048_s0 + $0x30] sm:$0xff]  ;;  %v431_v12 = vld [vmem:[%s3048_s0 + $0x38] sm:$0xff]  ;;  %v228_v22 = vld [vmem:[%s3049_s27 + $0x8] sm:$0xff]  ;;  %v146_v3 = vlaneseq }
  0x94   :  { %2035 = vmatprep.subr.bf16.mxu1 %v2034_v4  ;;  %v2046_v13 = vpack.c.bf16 %v431_v12, %v430_v11  ;;  %v230_v23 = vld [vmem:[%s3049_s27 + $0x18] sm:$0xff]  ;;  %v227_v24 = vld [vmem:[%s3049_s27] sm:$0xff]  ;;  %v229_v26 = vld [vmem:[%s3049_s27 + $0x10] sm:$0xff] }
  0x95   :  { %2037 = vmatpush3.bf16.msra.mxu1 %v2034_v4  ;;  %v2018_v25 = vpack.c.bf16 %v230_v23, %v228_v22  ;;  %v232_v27 = vld [vmem:[%s3049_s27 + $0x28] sm:$0xff]  ;;  %v234_v28 = vld [vmem:[%s3049_s27 + $0x38] sm:$0xff]  ;;  %v2020_v29 = vpack.c.bf16 %v229_v26, %v227_v24  ;;  %v231_v31 = vld [vmem:[%s3049_s27 + $0x20] sm:$0xff]  ;;  %v2701_v4 = vshrl.u32 %v146_v3, 7 }
  0x96   :  { %2039 = vmatprep.subr.bf16.mxu1 %v2038_v6  ;;  %v2022_v30 = vpack.c.bf16 %v234_v28, %v232_v27  ;;  %v233_v32 = vld [vmem:[%s3049_s27 + $0x30] sm:$0xff]  ;;  %v236_v33 = vld [vmem:[%s3049_s27 + $0x48] sm:$0xff]  ;;  %v238_v34 = vld [vmem:[%s3049_s27 + $0x58] sm:$0xff] }
  0x97   :  { %2019 = vmatprep.subr.bf16.mxu0 %v2018_v25  ;;  %v2024_v35 = vpack.c.bf16 %v233_v32, %v231_v31  ;;  %v2026_v36 = vpack.c.bf16 %v238_v34, %v236_v33  ;;  %v235_v37 = vld [vmem:[%s3049_s27 + $0x40] sm:$0xff]  ;;  %v237_v38 = vld [vmem:[%s3049_s27 + $0x50] sm:$0xff]  ;;  %v240_v39 = vld [vmem:[%s3049_s27 + $0x68] sm:$0xff]  ;;  %v149_v8 = vadd.s32 16, %v2701_v4  ;;  %vm349_vm5 = vcmp.lt.s32.totalorder %v2701_v4, 1 }
  0x98   :  { %2021 = vmatpush1.bf16.msra.mxu0 %v2020_v29  ;;  %v242_v40 = vld [vmem:[%s3049_s27 + $0x78] sm:$0xff]  ;;  %v2028_v41 = vpack.c.bf16 %v237_v38, %v235_v37  ;;  %v239_v43 = vld [vmem:[%s3049_s27 + $0x60] sm:$0xff]  ;;  %v241_v44 = vld [vmem:[%s3049_s27 + $0x70] sm:$0xff]  ;;  %vm358_vm8 = vcmp.lt.s32.totalorder %v2701_v4, 7 }
  0x99   :  { %2041 = vmatpush3.bf16.msra.mxu1 %v2038_v6  ;;  %2023 = vmatprep.subr.bf16.mxu0 %v2022_v30  ;;  %v2030_v42 = vpack.c.bf16 %v242_v40, %v240_v39  ;;  %v2032_v45 = vpack.c.bf16 %v241_v44, %v239_v43  ;;  %v722_v1 = vld [vmem:[%s3030_s10] sm:$0xff]  ;;  %v148_v6 = vadd.s32 8, %v2701_v4  ;;  %v169_v12 = vand.u32 15, %v149_v8  ;;  %s2352_s10 = smov 96  }
  0x9a   :  { %2043 = vmatprep.subr.bf16.mxu1 %v2042_v10  ;;  %v1735_v2 = vld [vmem:[%s3050_s7] ss:$0 sm:$0xff]  ;;  %v1741_v44 = vld [vmem:[#allocation8] ss:$0 sm:$0xff] }
  0x9b   :  { %369 = vrot.lane.b32.xlu0 %v1735_v2, %s2350_s24  ;;  %v162_v11 = vand.u32 15, %v148_v6  ;;  %vm201_vm6 = vcmp.ne.s32.totalorder %v169_v12, 0 }
  0x9c   :  { %2025 = vmatpush1.bf16.msra.mxu0 %v2024_v35  ;;  %v2728_v28 = vsel %vm201_vm6, 1.0, %v2347_v0 }
  0x9d   :  { %2045 = vmatpush3.bf16.msra.mxu1 %v2042_v10  ;;  %2027 = vmatprep.subr.bf16.mxu0 %v2026_v36  ;;  %vm212_vm7 = vcmp.ne.s32.totalorder %v162_v11, 15 }
  0x9e   :  { %2047 = vmatprep.subr.bf16.mxu1 %v2046_v13  ;;  %v2731_v30 = vsel %vm212_vm7, 1.0, %v2347_v0 }
  0xa0   :  { %2029 = vmatpush1.bf16.msra.mxu0 %v2028_v41 }
  0xa1   :  { %2049 = vmatpush3.bf16.msra.mxu1 %v2046_v13  ;;  %2031 = vmatprep.subr.bf16.mxu0 %v2030_v42 }
  0xa2   :  { %2050 = vmatprep.subr.bf16.mxu1 %v2348_v17 }
  0xa4   :  { %1880 = vmatmul.mubr.msk.f32.vlgmr.msra.gmra.mrb[0].mxu1 %vm243_vm0, %v2577_v14  ;;  %2033 = vmatpush1.bf16.msra.mxu0 %v2032_v45 }
  0xa5   :  { %1882 = vmatprep.mubr.msk.f32.mxu1 %vm243_vm0, %v2581_v16  ;;  %2052 = vmatpush3.bf16.msra.mxu1 %v2051_v15 }
  0xa6   :  { %2053 = vmatprep.subr.bf16.mxu1 %v2348_v17  ;;  %2056 = vmatprep.subr.bf16.mxu0 %v2348_v17 }
  0xa7   :  { %1731 = vmatmul.mubr.msk.f32.vlgmr.msra.gmra.mrb[0].mxu0 %vm243_vm0, %v2567_v9 }
  0xa8   :  { %1883 = vmatmul.mubr.msk.f32.gmra.mrb[2].mxu1 %vm243_vm0, %v2586_v18  ;;  %326 = vmatprep.mubr.f32.mxu0 %v2347_v0 }
  0xa9   :  { %2055 = vmatpush3.bf16.msra.mxu1 %v2054_v19  ;;  %1893 = vmatprep.mubr.msk.f32.mxu1 %vm2349_vm1, %v2347_v0 }
  0xaa   :  { %1896 = vmatprep.subr.msk.mxu1 %vm613_vm3, %v592_v21  ;;  %2058 = vmatpush3.bf16.msra.mxu0 %v2057_v48 }
  0xab   :  { %2059 = vmatprep.subr.bf16.mxu0 %v2348_v17  ;;  %1732 = vmatmul.mubr.msk.f32.gmra.mrb[2].mxu0 %vm243_vm0, %v2577_v14 }
  0xac   :  { %1894 = vmatmul.mubr.msk.f32.vlgmr.msra.gmra.mrb[4].mxu1 %vm518_vm2, %v517_v20  ;;  %332 = vmatprep.mubr.f32.mxu0 %v2347_v0 }
  0xad   :  { %1897 = vmatpush3.msk.msra.mxu1 %vm613_vm3, %v592_v21  ;;  %v155_v21 = vand.u32 15, %v2701_v4 }
  0xae   :  { %2061 = vmatpush3.bf16.msra.mxu0 %v2060_v51  ;;  %1904 = vmatprep.subr.mxu1 %v722_v1 }
  0xaf   :  { %2062 = vmatprep.subr.bf16.mxu0 %v2348_v17  ;;  %1733 = vmatmul.mubr.msk.f32.gmra.mrb[4].mxu0 %vm243_vm0, %v2581_v16  ;;  %vm199_vm9 = vcmp.ne.s32.totalorder %v155_v21, 0 }
  0xb0   :  { %338 = vmatprep.mubr.f32.mxu0 %v2347_v0  ;;  %v2744_v37 = vsel %vm199_vm9, 1.0, %v2347_v0 }
  0xb2   :  { %2064 = vmatpush3.bf16.msra.mxu0 %v2063_v54 }
  0xb3   :  { %2065 = vmatprep.subr.bf16.mxu0 %v2348_v17  ;;  %1734 = vmatmul.mubr.msk.f32.gmra.mrb[6].mxu0 %vm243_vm0, %v2586_v18 }
  0xb4   :  { %1936 = vmatprep.mubr.msk.f32.mxu0 %vm2349_vm1, %v2347_v0 }
  0xb6   :  { %2067 = vmatpush3.bf16.msra.mxu0 %v2066_v57 }
 0x177   :  { %v1881_v58 = vpop.f32.mrb[0].mxu1 }
 0x178   :  { %v498_v59 = vpop.f32.mrb[1].mxu1 }
 0x179   :  { %1898 = vmatprep.mubr.msk.f32.mxu1 %vm600_vm4, %v498_v59 }
 0x17a   :  { %1899 = vmatmul.mubr.msk.f32.vlgmr.msra.gmra.mrb[6].mxu1 %vm600_vm4, %v1881_v58  ;;  %v2703_v5 = vpop.f32.mrb[0].mxu0 }
 0x17b   :  { %v1884_v60 = vpop.f32.mrb[2].mxu1  ;;  %1905 = vmatpush3.msra.mxu1 %v722_v1  ;;  %v2706_v7 = vpop.f32.mrb[1].mxu0  ;;  %v345_v10 = vrot.slane %v2703_v5, 7 }
 0x17c   :  { %v508_v61 = vpop.f32.mrb[3].mxu1  ;;  %v354_v15 = vrot.slane %v2706_v7, 1 }
 0x17d   :  { %1901 = vmatprep.mubr.msk.f32.mxu1 %vm600_vm4, %v508_v61 }
 0x17e   :  { %1902 = vmatmul.mubr.msk.f32.gmra.mrb[8].mxu1 %vm600_vm4, %v1884_v60  ;;  %v2710_v13 = vpop.f32.mrb[2].mxu0 }
 0x17f   :  { %v588_v62 = vpop.f32.mrb[4].mxu1  ;;  %v346_v19 = vrot.slane %v2710_v13, 7  ;;  %v330_v20 = vpop.f32.mrb[3].mxu0 }
 0x180   :  { %1937 = vmatmul.mubr.msk.f32.vlgmr.msra.gmra.mrb[8].mxu0 %vm243_vm0, %v588_v62  ;;  %v1895_v63 = vpop.f32.mrb[5].mxu1  ;;  %v355_v22 = vrot.slane %v330_v20, 1 }
 0x181   :  { %v352_v23 = vsel %vm349_vm5, %v345_v10, %v346_v19 }
 0x182   :  { %v2718_v24 = vpop.f32.mrb[4].mxu0  ;;  %386 = vrot.lane.b32.xlu1 %v352_v23, %s2350_s24  ;;  %v361_v27 = vsel %vm358_vm8, %v354_v15, %v355_v22  ;;  %v1747_v23 = vld [vmem:[#allocation11] ss:$0 sm:$0xff] }
 0x183   :  { %v347_v25 = vrot.slane %v2718_v24, 7  ;;  %v336_v26 = vpop.f32.mrb[5].mxu0 }
 0x184   :  { %v356_v29 = vrot.slane %v336_v26, 1 }
 0x185   :  { %v351_v31 = vsel %vm349_vm5, %v346_v19, %v347_v25 }
 0x186   :  { %v2735_v32 = vpop.f32.mrb[6].mxu0  ;;  %v360_v33 = vsel %vm358_vm8, %v355_v22, %v356_v29  ;;  %408 = vrot.lane.b32.xlu1 %v361_v27, %s2350_s24  ;;  %v378_v34 = vmul.f32 %v2728_v28, %v351_v31  ;;  %v852_v22 = vld [vmem:[%s3034_s14] sm:$0xf] }
 0x187   :  { %v348_v35 = vrot.slane %v2735_v32, 7  ;;  %v401_v36 = vmul.f32 %v2731_v30, %v360_v33  ;;  %v2746_v38 = vpop.f32.mrb[7].mxu0  ;;  %1912 = vmatprep.subr.msk.mxu1 %vm613_vm3, %v852_v22 }
 0x188   :  { %v357_v42 = vrot.slane %v2746_v38, 1  ;;  %v370_v38 = vpop.permute.xlu0 %369 }
 0x189   :  { %410 = vrot.lane.b32.xlu0 %v401_v36, %s2350_s24  ;;  %v353_v39 = vsel %vm349_vm5, %v348_v35, %v345_v10  ;;  %v350_v40 = vsel %vm349_vm5, %v347_v25, %v348_v35 }
 0x18a   :  { %v376_v41 = vmul.f32 %v2744_v37, %v353_v39  ;;  %388 = vrot.lane.b32.xlu1 %v378_v34, %s2350_s24  ;;  %v359_v43 = vsel %vm358_vm8, %v356_v29, %v357_v42 }
 0x18d   :  { %384 = vrot.lane.b32.xlu0 %v376_v41, %s2350_s24 }
 0x18e   :  { %390 = vrot.lane.b32.xlu1 %v350_v40, %s2350_s24 }
 0x192   :  { %412 = vrot.lane.b32.xlu1 %v359_v43, %s2350_s24 }
 0x24d   :  { %v1900_v45 = vpop.f32.mrb[6].mxu1 }
 0x24e   :  { %v689_v46 = vadd.f32 %v1900_v45, %v1741_v44  ;;  %v683_v47 = vpop.f32.mrb[7].mxu1 }
 0x24f   :  { %v684_v48 = vadd.f32 %v1741_v44, %v683_v47 }
 0x250   :  { %v703_v49 = vadd.f32 3.0, %v689_v46 }
 0x251   :  { %v702_v50 = vadd.f32 3.0, %v684_v48  ;;  %v1903_v51 = vpop.f32.mrb[8].mxu1 }
 0x252   :  { %v707_v52 = vmax.f32 %v703_v49, 0.0  ;;  %v699_v53 = vadd.f32 %v1903_v51, %v1741_v44  ;;  %v693_v54 = vpop.f32.mrb[9].mxu1  ;;  %v1046_v51 = vld [vmem:[%s3032_s12] sm:$0xff] }
 0x253   :  { %v706_v55 = vmax.f32 %v702_v50, 0.0  ;;  %v694_v56 = vadd.f32 %v1741_v44, %v693_v54  ;;  %v2763_v57 = vpop.f32.mrb[8].mxu0 }
 0x254   :  { %v711_v58 = vmin.f32 %v707_v52, 6.0  ;;  %v705_v59 = vadd.f32 3.0, %v699_v53  ;;  %v1938_v60 = vpop.f32.mrb[9].mxu0  ;;  %v1047_v52 = vld [vmem:[%s3032_s12 + $0x8] sm:$0xff] }
 0x255   :  { %v710_v61 = vmin.f32 %v706_v55, 6.0  ;;  %v704_v62 = vadd.f32 3.0, %v694_v56  ;;  %v1048_v55 = vld [vmem:[%s3032_s12 + $0x10] sm:$0xff] }
 0x256   :  { %v715_v63 = vmul.f32 %v711_v58, %v689_v46  ;;  %v709_v1 = vmax.f32 %v705_v59, 0.0 }
 0x257   :  { %v714_v2 = vmul.f32 %v710_v61, %v684_v48  ;;  %v708_v3 = vmax.f32 %v704_v62, 0.0  ;;  %v1050_v62 = vld [vmem:[%s3032_s12 + $0x20] sm:$0xff] }
 0x258   :  { %v713_v6 = vmin.f32 %v709_v1, 6.0  ;;  %v719_v11 = vmul.f32 0.16666667, %v715_v63  ;;  %v1051_v63 = vld [vmem:[%s3032_s12 + $0x28] sm:$0xff] }
 0x259   :  { %v718_v8 = vmul.f32 0.16666667, %v714_v2  ;;  %v712_v10 = vmin.f32 %v708_v3, 6.0  ;;  %v2075_v1 = vpack.c.bf16 %v1051_v63, %v1050_v62  ;;  %v1052_v2 = vld [vmem:[%s3032_s12 + $0x30] sm:$0xff]  ;;  %v1053_v3 = vld [vmem:[%s3032_s12 + $0x38] sm:$0xff] }
 0x25a   :  { %v717_v12 = vmul.f32 %v713_v6, %v699_v53  ;;  %v2069_v53 = vpack.c.bf16 %v1047_v52, %v1046_v51  ;;  %v1761_v6 = vld [vmem:[#allocation10] ss:$0 sm:$0xff] }
 0x25b   :  { %1906 = vmatprep.mubr.msk.f32.mxu1 %vm730_vm10, %v718_v8  ;;  %v716_v19 = vmul.f32 %v712_v10, %v694_v56  ;;  %v1049_v56 = vld [vmem:[%s3032_s12 + $0x18] sm:$0xff]  ;;  %v2078_v8 = vpack.c.bf16 %v1053_v3, %v1052_v2  ;;  %v1038_v10 = vadd.f32 %v1761_v6, %v2763_v57  ;;  %v1146_v52 = vld [vmem:[%s3025_s5 + $0x8] sm:$0xff]  ;;  %v1279_v6 = vld [vmem:[%s3035_s15] sm:$0xff] }
 0x25c   :  { %v721_v20 = vmul.f32 0.16666667, %v717_v12  ;;  %1907 = vmatmul.mubr.msk.f32.vlgmr.msra.gmra.mrb[10].mxu1 %vm730_vm10, %v719_v11  ;;  %v2072_v60 = vpack.c.bf16 %v1049_v56, %v1048_v55  ;;  %v1054_v11 = vld [vmem:[%s3032_s12 + $0x40] sm:$0xff]  ;;  %v1055_v12 = vld [vmem:[%s3032_s12 + $0x48] sm:$0xff]  ;;  %v1057_v57 = vld [vmem:[%s3032_s12 + $0x58] sm:$0xff]  ;;  %v150_v55 = vadd.s32 24, %v2701_v4 }
 0x25d   :  { %v720_v21 = vmul.f32 0.16666667, %v716_v19  ;;  %1913 = vmatpush3.msk.msra.mxu1 %vm613_vm3, %v852_v22  ;;  %v2081_v19 = vpack.c.bf16 %v1055_v12, %v1054_v11 }
 0x25e   :  { %2068 = vmatprep.subr.bf16.mxu1 %v2348_v17 }
 0x25f   :  { %1909 = vmatprep.mubr.msk.f32.mxu1 %vm730_vm10, %v720_v21  ;;  %v1056_v21 = vld [vmem:[%s3032_s12 + $0x50] sm:$0xff] }
 0x260   :  { %1910 = vmatmul.mubr.msk.f32.gmra.mrb[12].mxu1 %vm730_vm10, %v721_v20  ;;  %v1041_v20 = vadd.f32 3.0, %v1038_v10  ;;  %v2084_v22 = vpack.c.bf16 %v1057_v57, %v1056_v21  ;;  %v1283_v21 = vld [vmem:[%s3035_s15 + $0x20] sm:$0xff]  ;;  %v1284_v57 = vld [vmem:[%s3035_s15 + $0x28] sm:$0xff] }
 0x261   :  { %v2100_v7 = vpack.c.bf16 %v1284_v57, %v1283_v21  ;;  %v1485_v57 = vld [vmem:[%s3037_s17] sm:$0xff] }
 0x32f   :  { %v1908_v25 = vpop.f32.mrb[10].mxu1 }
 0x330   :  { %v815_v26 = vadd.f32 %v1908_v25, %v1747_v23  ;;  %v809_v27 = vpop.f32.mrb[11].mxu1  ;;  %v1058_v25 = vld [vmem:[%s3032_s12 + $0x60] sm:$0xff] }
 0x331   :  { %v810_v29 = vadd.f32 %v1747_v23, %v809_v27 }
 0x332   :  { %v1753_v31 = vmul.f32 -1.442695, %v815_v26  ;;  %v1059_v26 = vld [vmem:[%s3032_s12 + $0x68] sm:$0xff] }
 0x333   :  { %v1752_v33 = vmul.f32 -1.442695, %v810_v29  ;;  %v1911_v34 = vpop.f32.mrb[12].mxu1  ;;  %v2087_v27 = vpack.c.bf16 %v1059_v26, %v1058_v25  ;;  %v411_v26 = vpop.permute.xlu0 %410 }
 0x334   :  { %2132 = vpow2.f32 %v1753_v31  ;;  %v825_v35 = vadd.f32 %v1911_v34, %v1747_v23  ;;  %v819_v36 = vpop.f32.mrb[13].mxu1  ;;  %v1060_v31 = vld [vmem:[%s3032_s12 + $0x70] sm:$0xff] }
 0x335   :  { %2134 = vpow2.f32 %v1752_v33  ;;  %v820_v39 = vadd.f32 %v1747_v23, %v819_v36  ;;  %v1042_v23 = vmax.f32 %v1041_v20, 0.0  ;;  %v1061_v33 = vld [vmem:[%s3032_s12 + $0x78] sm:$0xff]  ;;  %s2351_s12 = smov 32  }
 0x336   :  { %v1755_v40 = vmul.f32 -1.442695, %v825_v35  ;;  %v2090_v34 = vpack.c.bf16 %v1061_v33, %v1060_v31  ;;  %v372_v33 = vadd.f32 %v370_v38, %v2703_v5 }
 0x337   :  { %v1754_v41 = vmul.f32 -1.442695, %v820_v39  ;;  %v1043_v29 = vmin.f32 %v1042_v23, 6.0  ;;  %v1145_v39 = vld [vmem:[%s3025_s5] sm:$0xff]  ;;  %v1286_v23 = vld [vmem:[%s3035_s15 + $0x38] sm:$0xff] }
 0x338   :  { %2136 = vpow2.f32 %v1755_v40  ;;  %1976 = vmatprep.mubr.msk.f32.mxu0 %vm1149_vm11, %v1145_v39 }
 0x339   :  { %2138 = vpow2.f32 %v1754_v41  ;;  %v1044_v35 = vmul.f32 %v1043_v29, %v1038_v10  ;;  %v373_v29 = vadd.f32 %v370_v38, %v2710_v13  ;;  %v375_v13 = vadd.f32 %v370_v38, %v2735_v32 }
 0x33b   :  { %v1045_v36 = vmul.f32 0.16666667, %v1044_v35 }
 0x33e   :  { %v2133_v43 = vpop.eup %2132 }
 0x33f   :  { %v2135_v44 = vpop.eup %2134  ;;  %v841_v45 = vadd.f32 1.0, %v2133_v43 }
 0x340   :  { %v840_v46 = vadd.f32 1.0, %v2135_v44 }
 0x342   :  { %v2137_v47 = vpop.eup %2136  ;;  %2140 = vrcp.f32 %v840_v46 }
 0x343   :  { %v2139_v48 = vpop.eup %2138  ;;  %2142 = vrcp.f32 %v841_v45  ;;  %v843_v49 = vadd.f32 1.0, %v2137_v47  ;;  %v1763_v45 = vld [vmem:[#allocation13] ss:$0 sm:$0xff] }
 0x344   :  { %v842_v50 = vadd.f32 1.0, %v2139_v48 }
 0x345   :  { %2144 = vrcp.f32 %v843_v49 }
 0x346   :  { %2146 = vrcp.f32 %v842_v50 }
 0x34c   :  { %v2141_v54 = vpop.eup %2140 }
 0x34d   :  { %v2143_v58 = vpop.eup %2142  ;;  %1914 = vmatprep.mubr.msk.f32.mxu1 %vm600_vm4, %v2141_v54  ;;  %v1148_v54 = vld [vmem:[%s3025_s5 + $0x18] sm:$0xff] }
 0x34e   :  { %1915 = vmatmul.mubr.msk.f32.vlgmr.msra.gmra.mrb[14].mxu1 %vm600_vm4, %v2143_v58  ;;  %v176_v58 = vand.u32 15, %v150_v55 }
 0x34f   :  { %v2145_v59 = vpop.eup %2144  ;;  %2070 = vmatpush3.bf16.msra.mxu1 %v2069_v53  ;;  %v1147_v53 = vld [vmem:[%s3025_s5 + $0x10] sm:$0xff] }
 0x350   :  { %v2147_v61 = vpop.eup %2146  ;;  %2071 = vmatprep.subr.bf16.mxu1 %v2348_v17  ;;  %vm214_vm13 = vcmp.ne.s32.totalorder %v176_v58, 15 }
 0x351   :  { %1917 = vmatprep.mubr.msk.f32.mxu1 %vm600_vm4, %v2147_v61  ;;  %v2868_v12 = vsel %vm214_vm13, 1.0, %v2347_v0 }
 0x352   :  { %1918 = vmatmul.mubr.msk.f32.gmra.mrb[16].mxu1 %vm600_vm4, %v2145_v59 }
 0x353   :  { %2073 = vmatpush3.bf16.msra.mxu1 %v2072_v60  ;;  %1971 = vmatprep.mubr.msk.f32.mxu1 %vm2349_vm1, %v2347_v0 }
 0x354   :  { %2074 = vmatprep.subr.bf16.mxu1 %v2348_v17 }
 0x357   :  { %2076 = vmatpush3.bf16.msra.mxu1 %v2075_v1 }
 0x358   :  { %2077 = vmatprep.subr.bf16.mxu1 %v2348_v17 }
 0x35b   :  { %2079 = vmatpush3.bf16.msra.mxu1 %v2078_v8 }
 0x35c   :  { %2080 = vmatprep.subr.bf16.mxu1 %v2348_v17 }
 0x35f   :  { %2082 = vmatpush3.bf16.msra.mxu1 %v2081_v19  ;;  %v362_v19 = vsel %vm358_vm8, %v357_v42, %v354_v15  ;;  %v387_v15 = vpop.permute.xlu1 %386 }
 0x360   :  { %2083 = vmatprep.subr.bf16.mxu1 %v2348_v17  ;;  %v403_v0 = vmul.f32 %v2868_v12, %v362_v19  ;;  %v397_v31 = vadd.f32 %v387_v15, %v373_v29 }
 0x363   :  { %2085 = vmatpush3.bf16.msra.mxu1 %v2084_v22  ;;  %v409_v42 = vpop.permute.xlu1 %408  ;;  %v1285_v22 = vld [vmem:[%s3035_s15 + $0x30] sm:$0xff] }
 0x364   :  { %2086 = vmatprep.subr.bf16.mxu1 %v2348_v17  ;;  %v2104_v25 = vpack.c.bf16 %v1286_v23, %v1285_v22 }
 0x367   :  { %2088 = vmatpush3.bf16.msra.mxu1 %v2087_v27  ;;  %v389_v27 = vpop.permute.xlu1 %388 }
 0x368   :  { %2089 = vmatprep.subr.bf16.mxu1 %v2348_v17 }
 0x36b   :  { %2091 = vmatpush3.bf16.msra.mxu1 %v2090_v34  ;;  %v385_v34 = vpop.permute.xlu0 %384  ;;  %v391_v35 = vpop.permute.xlu1 %390 }
 0x36c   :  { %v396_v39 = vadd.f32 %v385_v34, %v372_v33  ;;  %v1487_v34 = vld [vmem:[%s3037_s17 + $0x10] sm:$0xff] }
 0x36e   :  { %1972 = vmatmul.mubr.f32.vlgmr.msra.gmra.mrb[18].mxu1 %v1045_v36  ;;  %v421_v36 = vadd.f32 %v411_v26, %v397_v31 }
 0x421   :  { %v1916_v40 = vpop.f32.mrb[14].mxu1 }
 0x422   :  { %v934_v41 = vpop.f32.mrb[15].mxu1  ;;  %v1252_v56 = vmul.f32 %v1916_v40, %v2577_v14  ;;  %v1281_v14 = vld [vmem:[%s3035_s15 + $0x10] sm:$0xff]  ;;  %v374_v40 = vadd.f32 %v370_v38, %v2718_v24 }
 0x423   :  { %v1251_v59 = vmul.f32 %v934_v41, %v2567_v9  ;;  %v1280_v9 = vld [vmem:[%s3035_s15 + $0x8] sm:$0xff] }
 0x424   :  { %v2092_v10 = vpack.c.bf16 %v1280_v9, %v1279_v6 }
 0x425   :  { %v1919_v43 = vpop.f32.mrb[16].mxu1 }
 0x426   :  { %v944_v44 = vpop.f32.mrb[17].mxu1  ;;  %v1254_v1 = vmul.f32 %v1919_v43, %v2586_v18 }
 0x427   :  { %v1253_v2 = vmul.f32 %v944_v44, %v2581_v16  ;;  %v1282_v16 = vld [vmem:[%s3035_s15 + $0x18] sm:$0xff]  ;;  %v413_v44 = vpop.permute.xlu1 %412 }
 0x428   :  { %v2096_v20 = vpack.c.bf16 %v1282_v16, %v1281_v14 }
 0x441   :  { %v1135_v46 = vpop.f32.mrb[18].mxu1 }
 0x442   :  { %v1136_v47 = vadd.f32 %v1763_v45, %v1135_v46  ;;  %v1973_v48 = vpop.f32.mrb[19].mxu1  ;;  %v398_v45 = vadd.f32 %v389_v27, %v374_v40  ;;  %v420_v46 = vadd.f32 %v409_v42, %v396_v39 }
 0x444   :  { %v1764_v49 = vmul.f32 -1.442695, %v1136_v47 }
 0x446   :  { %2148 = vpow2.f32 %v1764_v49 }
 0x450   :  { %v2149_v17 = vpop.eup %2148 }
 0x451   :  { %v1142_v50 = vadd.f32 1.0, %v2149_v17  ;;  %v422_v17 = vadd.f32 %v413_v44, %v398_v45 }
 0x453   :  { %2150 = vrcp.f32 %v1142_v50  ;;  %v399_v50 = vadd.f32 %v391_v35, %v375_v13  ;;  %v1488_v35 = vld [vmem:[%s3037_s17 + $0x18] sm:$0xff] }
 0x45d   :  { %v2151_v51 = vpop.eup %2150 }
 0x45e   :  { %1974 = vmatprep.subr.msk.mxu0 %vm1162_vm12, %v2151_v51 }
 0x45f   :  { %1975 = vmatpush3.msk.msra.mxu0 %vm1162_vm12, %v2151_v51 }
 0x460   :  { %1977 = vmatmul.mubr.msk.f32.vlgmr.msra.gmra.mrb[10].mxu0 %vm1149_vm11, %v1146_v52  ;;  %2093 = vmatprep.subr.bf16.mxu0 %v2092_v10 }
 0x461   :  { %1979 = vmatprep.mubr.msk.f32.mxu0 %vm1149_vm11, %v1147_v53  ;;  %2095 = vmatpush3.bf16.msra.mxu0 %v2092_v10 }
 0x462   :  { %2097 = vmatprep.subr.bf16.mxu0 %v2096_v20 }
 0x464   :  { %1980 = vmatmul.mubr.msk.f32.gmra.mrb[12].mxu0 %vm1149_vm11, %v1148_v54 }
 0x465   :  { %2099 = vmatpush3.bf16.msra.mxu0 %v2096_v20 }
 0x466   :  { %2101 = vmatprep.subr.bf16.mxu0 %v2100_v7 }
 0x469   :  { %2103 = vmatpush3.bf16.msra.mxu0 %v2100_v7 }
 0x46a   :  { %2105 = vmatprep.subr.bf16.mxu0 %v2104_v25 }
 0x46d   :  { %2107 = vmatpush3.bf16.msra.mxu0 %v2104_v25 }
 0x533   :  { %v1978_v60 = vpop.f32.mrb[10].mxu0 }
 0x534   :  { %v1256_v61 = vmul.f32 %v1978_v60, %v1252_v56  ;;  %v1232_v62 = vpop.f32.mrb[11].mxu0 }
 0x535   :  { %v1255_v63 = vmul.f32 %v1251_v59, %v1232_v62 }
 0x536   :  { %1265 = vrot.lane.b32.xlu0 %v1256_v61, %s2350_s24 }
 0x537   :  { %v1981_v3 = vpop.f32.mrb[12].mxu0 }
 0x538   :  { %v1258_v8 = vmul.f32 %v1981_v3, %v1254_v1  ;;  %v1242_v18 = vpop.f32.mrb[13].mxu0 }
 0x539   :  { %v1257_v11 = vmul.f32 %v1253_v2, %v1242_v18 }
 0x53a   :  { %1263 = vrot.lane.b32.xlu0 %v1255_v63, %s2350_s24  ;;  %v1774_v63 = vld [vmem:[%s3036_s16] ss:$0 sm:$0xff] }
 0x53b   :  { %1267 = vrot.lane.b32.xlu1 %v1257_v11, %s2350_s24 }
 0x53e   :  { %414 = vrot.lane.b32.xlu0 %v403_v0, %s2350_s24  ;;  %v1486_v0 = vld [vmem:[%s3037_s17 + $0x8] sm:$0xff] }
 0x53f   :  { %v2108_v15 = vpack.c.bf16 %v1486_v0, %v1485_v57 }
 0x541   :  { %2109 = vmatprep.subr.bf16.mxu0 %v2108_v15 }
 0x542   :  { %1269 = vrot.lane.b32.xlu0 %v1258_v8, %s2350_s24 }
 0x5a8   :  { %v1266_v41 = vpop.permute.xlu0 %1265 }
 0x5a9   :  { %v1276_v43 = vmul.f32 %v1266_v41, %v421_v36  ;;  %v2112_v36 = vpack.c.bf16 %v1488_v35, %v1487_v34 }
 0x5ab   :  { %1293 = vrot.lane.b32.xlu0 %v1276_v43, %s2350_s24 }
 0x5ac   :  { %v1264_v47 = vpop.permute.xlu0 %1263 }
 0x5ad   :  { %v1275_v48 = vmul.f32 %v1264_v47, %v420_v46  ;;  %v1268_v49 = vpop.permute.xlu1 %1267 }
 0x5ae   :  { %v1277_v51 = vmul.f32 %v1268_v49, %v422_v17 }
 0x5af   :  { %1291 = vrot.lane.b32.xlu1 %v1275_v48, %s2350_s24 }
 0x5b0   :  { %v415_v5 = vpop.permute.xlu0 %414 }
 0x5b1   :  { %v423_v52 = vadd.f32 %v415_v5, %v399_v50 }
 0x5b3   :  { %1295 = vrot.lane.b32.xlu1 %v1277_v51, %s2350_s24 }
 0x5b4   :  { %v1270_v24 = vpop.permute.xlu0 %1269 }
 0x5b5   :  { %v1278_v53 = vmul.f32 %v1270_v24, %v423_v52 }
 0x5b7   :  { %1297 = vrot.lane.b32.xlu0 %v1278_v53, %s2350_s24 }
 0x61d   :  { %v1294_v55 = vpop.permute.xlu0 %1293 }
 0x621   :  { %v1292_v54 = vpop.permute.xlu1 %1291 }
 0x622   :  { %1998 = vmatprep.mubr.msk.f32.mxu0 %vm243_vm0, %v1292_v54 }
 0x623   :  { %1999 = vmatmul.mubr.msk.f32.vlgmr.msra.gmra.mrb[14].mxu0 %vm243_vm0, %v1294_v55 }
 0x624   :  { %2111 = vmatpush3.bf16.msra.mxu0 %v2108_v15 }
 0x625   :  { %v1296_v32 = vpop.permute.xlu1 %1295  ;;  %2113 = vmatprep.subr.bf16.mxu0 %v2112_v36 }
 0x626   :  { %2001 = vmatprep.mubr.msk.f32.mxu0 %vm243_vm0, %v1296_v32 }
 0x628   :  { %2115 = vmatpush3.bf16.msra.mxu0 %v2112_v36 }
 0x629   :  { %v1298_v56 = vpop.permute.xlu0 %1297 }
 0x62a   :  { %2002 = vmatmul.mubr.msk.f32.gmra.mrb[16].mxu0 %vm243_vm0, %v1298_v56 }
 0x6f6   :  { %v2000_v58 = vpop.f32.mrb[14].mxu0 }
 0x6f7   :  { %v1393_v59 = vrot.slane %v2000_v58, 7  ;;  %1406 = vrot.lane.b32.xlu1 %v2000_v58, %s2350_s24  ;;  %v1373_v60 = vpop.f32.mrb[15].mxu0 }
 0x6f8   :  { %v1392_v61 = vrot.slane %v1373_v60, 7 }
 0x6fa   :  { %v1398_v62 = vsel %vm349_vm5, %v1392_v61, %v1393_v59 }
 0x6fb   :  { %1404 = vrot.lane.b32.xlu1 %v1373_v60, %s2350_s24 }
 0x6fd   :  { %v2003_v1 = vpop.f32.mrb[16].mxu0 }
 0x6fe   :  { %v1395_v2 = vrot.slane %v2003_v1, 7  ;;  %v1383_v3 = vpop.f32.mrb[17].mxu0 }
 0x6ff   :  { %v1394_v6 = vrot.slane %v1383_v3, 7  ;;  %1430 = vrot.lane.b32.xlu1 %v1774_v63, %s2351_s12  ;;  %1408 = vrot.lane.b32.xlu0 %v1383_v3, %s2350_s24 }
 0x700   :  { %v1399_v9 = vsel %vm349_vm5, %v1395_v2, %v1392_v61 }
 0x701   :  { %v1396_v14 = vsel %vm349_vm5, %v1394_v6, %v1395_v2  ;;  %v1397_v8 = vsel %vm349_vm5, %v1393_v59, %v1394_v6  ;;  %v1437_v18 = vmul.f32 %v2744_v37, %v1399_v9 }
 0x702   :  { %v1439_v10 = vmul.f32 %v2728_v28, %v1397_v8 }
 0x703   :  { %1447 = vrot.lane.b32.xlu1 %v1398_v62, %s2351_s12  ;;  %1410 = vrot.lane.b32.xlu0 %v2003_v1, %s2350_s24 }
 0x707   :  { %1445 = vrot.lane.b32.xlu0 %v1437_v18, %s2351_s12  ;;  %1451 = vrot.lane.b32.xlu1 %v1396_v14, %s2351_s12  ;;  %v1779_v14 = vld [vmem:[%s3038_s18] ss:$0 sm:$0xff]  ;;  %s2353_s18 = smov [#allocation14]  }
 0x70b   :  { %1449 = vrot.lane.b32.xlu0 %v1439_v10, %s2351_s12 }
 0x769   :  { %v1407_v16 = vpop.permute.xlu1 %1406 }
 0x76a   :  { %v1417_v19 = vrot.slane %v1407_v16, 1 }
 0x76d   :  { %v1405_v11 = vpop.permute.xlu1 %1404 }
 0x76e   :  { %v1416_v20 = vrot.slane %v1405_v11, 1 }
 0x770   :  { %v1422_v21 = vsel %vm358_vm8, %v1416_v20, %v1417_v19 }
 0x771   :  { %v1409_v7 = vpop.permute.xlu0 %1408  ;;  %1469 = vrot.lane.b32.xlu0 %v1422_v21, %s2351_s12  ;;  %v1431_v31 = vpop.permute.xlu1 %1430 }
 0x772   :  { %v1418_v38 = vrot.slane %v1409_v7, 1  ;;  %v1433_v41 = vadd.f32 %v1431_v31, %v1373_v60  ;;  %v1434_v47 = vadd.f32 %v2000_v58, %v1431_v31  ;;  %v1435_v48 = vadd.f32 %v1431_v31, %v1383_v3 }
 0x773   :  { %v1436_v17 = vadd.f32 %v2003_v1, %v1431_v31 }
 0x774   :  { %v1421_v42 = vsel %vm358_vm8, %v1417_v19, %v1418_v38 }
 0x775   :  { %v1411_v22 = vpop.permute.xlu0 %1410  ;;  %v1462_v23 = vmul.f32 %v2731_v30, %v1421_v42  ;;  %v1448_v39 = vpop.permute.xlu1 %1447 }
 0x776   :  { %v1419_v25 = vrot.slane %v1411_v22, 1  ;;  %v1458_v13 = vadd.f32 %v1448_v39, %v1434_v47 }
 0x777   :  { %1471 = vrot.lane.b32.xlu1 %v1462_v23, %s2351_s12 }
 0x778   :  { %v1420_v26 = vsel %vm358_vm8, %v1418_v38, %v1419_v25  ;;  %v1423_v27 = vsel %vm358_vm8, %v1419_v25, %v1416_v20 }
 0x779   :  { %1473 = vrot.lane.b32.xlu0 %v1420_v26, %s2351_s12  ;;  %v1464_v29 = vmul.f32 %v2868_v12, %v1423_v27  ;;  %v1446_v33 = vpop.permute.xlu0 %1445  ;;  %v1452_v46 = vpop.permute.xlu1 %1451 }
 0x77a   :  { %v1457_v43 = vadd.f32 %v1446_v33, %v1433_v41  ;;  %v1460_v52 = vadd.f32 %v1452_v46, %v1436_v17 }
 0x77b   :  { %1475 = vrot.lane.b32.xlu1 %v1464_v29, %s2351_s12 }
 0x77d   :  { %v1450_v40 = vpop.permute.xlu0 %1449 }
 0x77e   :  { %v1459_v5 = vadd.f32 %v1450_v40, %v1435_v48 }
 0x7e3   :  { %v1470_v44 = vpop.permute.xlu0 %1469 }
 0x7e4   :  { %v1481_v45 = vadd.f32 %v1470_v44, %v1457_v43 }
 0x7e6   :  { %1493 = vrot.lane.b32.xlu0 %v1481_v45, %s2352_s10 }
 0x7e9   :  { %v1472_v49 = vpop.permute.xlu1 %1471 }
 0x7ea   :  { %v1482_v50 = vadd.f32 %v1472_v49, %v1458_v13 }
 0x7eb   :  { %v1474_v51 = vpop.permute.xlu0 %1473 }
 0x7ec   :  { %v1483_v24 = vadd.f32 %v1474_v51, %v1459_v5  ;;  %1495 = vrot.lane.b32.xlu1 %v1482_v50, %s2352_s10 }
 0x7ed   :  { %v1476_v53 = vpop.permute.xlu1 %1475 }
 0x7ee   :  { %v1484_v54 = vadd.f32 %v1476_v53, %v1460_v52  ;;  %1497 = vrot.lane.b32.xlu0 %v1483_v24, %s2352_s10 }
 0x7f0   :  { %1499 = vrot.lane.b32.xlu1 %v1484_v54, %s2352_s10 }
 0x858   :  { %v1494_v55 = vpop.permute.xlu0 %1493 }
 0x859   :  { %2012 = vmatprep.mubr.msk.f32.mxu0 %vm518_vm2, %v1494_v55 }
 0x85e   :  { %v1496_v32 = vpop.permute.xlu1 %1495 }
 0x85f   :  { %2013 = vmatmul.mubr.msk.f32.vlgmr.msra.gmra.mrb[18].mxu0 %vm518_vm2, %v1496_v32 }
 0x860   :  { %v1498_v56 = vpop.permute.xlu0 %1497 }
 0x861   :  { %2015 = vmatprep.mubr.msk.f32.mxu0 %vm518_vm2, %v1498_v56 }
 0x862   :  { %v1500_v58 = vpop.permute.xlu1 %1499 }
 0x863   :  { %2016 = vmatmul.mubr.msk.f32.gmra.mrb[20].mxu0 %vm518_vm2, %v1500_v58 }
 0x932   :  { %v2014_v59 = vpop.f32.mrb[18].mxu0 }
 0x933   :  { %v1595_v60 = vrot.slane %v2014_v59, 7  ;;  %1608 = vrot.lane.b32.xlu1 %v2014_v59, %s2350_s24  ;;  %v1575_v61 = vpop.f32.mrb[19].mxu0 }
 0x934   :  { %v1594_v62 = vrot.slane %v1575_v61, 7  ;;  %1606 = vrot.lane.b32.xlu0 %v1575_v61, %s2350_s24 }
 0x936   :  { %v2017_v63 = vpop.f32.mrb[20].mxu0  ;;  %v1600_v1 = vsel %vm349_vm5, %v1594_v62, %v1595_v60 }
 0x937   :  { %v1597_v2 = vrot.slane %v2017_v63, 7  ;;  %1612 = vrot.lane.b32.xlu1 %v2017_v63, %s2350_s24  ;;  %v1585_v3 = vpop.f32.mrb[21].mxu0 }
 0x938   :  { %v1596_v6 = vrot.slane %v1585_v3, 7  ;;  %1610 = vrot.lane.b32.xlu0 %v1585_v3, %s2350_s24  ;;  %s1712_s24 = sshll.u32 %s2353_s18, 4  ;;  %s1713_s24 = int_to_ptr.vmem [resolvable:$true] %s1712_s24 }
 0x939   :  { %v1601_v9 = vsel %vm349_vm5, %v1597_v2, %v1594_v62  ;;  %s2306_s14 = scalar_lea.vmem %s1713_s24, 512  ;;  %p2311_p1 = scmp.lt.s32.totalorder %s1713_s24, %s1713_s24 }
 0x93a   :  { %v1639_v8 = vmul.f32 %v2744_v37, %v1601_v9  ;;  %v1599_v18 = vsel %vm349_vm5, %v1595_v60, %v1596_v6  ;;  %v1598_v10 = vsel %vm349_vm5, %v1596_v6, %v1597_v2  ;;  %p2307_p0 = scmp.ne.s32.totalorder %s1713_s24, %s2306_s14  ;;  %p2312_p2 = scmp.lt.s32.totalorder %s2306_s14, %s2306_s14 }
 0x93b   :  { %v1641_v16 = vmul.f32 %v2728_v28, %v1599_v18 }
 0x93c   :  { %1647 = vrot.lane.b32.xlu1 %v1639_v8, %s2351_s12  ;;  %1632 = vrot.lane.b32.xlu0 %v1779_v14, %s2351_s12  ;;  %p2313_p3 = por %p2312_p2, %p2311_p1 }
 0x93e   :  { %p2314_p4 = pnand %p2313_p3, %p2307_p0 }
 0x940   :  { %1649 = vrot.lane.b32.xlu0 %v1600_v1, %s2351_s12  ;;  %1651 = vrot.lane.b32.xlu1 %v1641_v16, %s2351_s12 }
 0x944   :  { %1653 = vrot.lane.b32.xlu0 %v1598_v10, %s2351_s12 }
 0x9a5   :  { %v1609_v11 = vpop.permute.xlu1 %1608 }
 0x9a6   :  { %v1619_v37 = vrot.slane %v1609_v11, 1  ;;  %v1607_v19 = vpop.permute.xlu0 %1606 }
 0x9a7   :  { %v1618_v20 = vrot.slane %v1607_v19, 1 }
 0x9a9   :  { %v1613_v21 = vpop.permute.xlu1 %1612  ;;  %v1624_v57 = vsel %vm358_vm8, %v1618_v20, %v1619_v37 }
 0x9aa   :  { %v1621_v0 = vrot.slane %v1613_v21, 1  ;;  %v1611_v7 = vpop.permute.xlu0 %1610  ;;  %1671 = vrot.lane.b32.xlu1 %v1624_v57, %s2351_s12 }
 0x9ab   :  { %v1620_v15 = vrot.slane %v1611_v7, 1 }
 0x9ac   :  { %v1625_v22 = vsel %vm358_vm8, %v1621_v0, %v1618_v20 }
 0x9ad   :  { %v1622_v28 = vsel %vm358_vm8, %v1620_v15, %v1621_v0  ;;  %v1623_v38 = vsel %vm358_vm8, %v1619_v37, %v1620_v15  ;;  %v1666_v23 = vmul.f32 %v2868_v12, %v1625_v22 }
 0x9ae   :  { %1675 = vrot.lane.b32.xlu1 %v1622_v28, %s2351_s12  ;;  %v1664_v42 = vmul.f32 %v2731_v30, %v1623_v38  ;;  %v1633_v25 = vpop.permute.xlu0 %1632  ;;  %v1648_v26 = vpop.permute.xlu1 %1647 }
 0x9af   :  { %v1635_v27 = vadd.f32 %v1633_v25, %v1575_v61  ;;  %v1637_v35 = vadd.f32 %v1633_v25, %v1585_v3  ;;  %v1636_v30 = vadd.f32 %v2014_v59, %v1633_v25  ;;  %v1638_v44 = vadd.f32 %v2017_v63, %v1633_v25 }
 0x9b0   :  { %1673 = vrot.lane.b32.xlu0 %v1664_v42, %s2351_s12 }
 0x9b1   :  { %v1659_v33 = vadd.f32 %v1648_v26, %v1635_v27 }
 0x9b2   :  { %v1650_v29 = vpop.permute.xlu0 %1649  ;;  %v1652_v31 = vpop.permute.xlu1 %1651 }
 0x9b3   :  { %v1661_v40 = vadd.f32 %v1652_v31, %v1637_v35  ;;  %v1660_v41 = vadd.f32 %v1650_v29, %v1636_v30 }
 0x9b4   :  { %1677 = vrot.lane.b32.xlu0 %v1666_v23, %s2351_s12 }
 0x9b6   :  { %v1654_v39 = vpop.permute.xlu0 %1653 }
 0x9b7   :  { %v1662_v46 = vadd.f32 %v1654_v39, %v1638_v44 }
 0xa1c   :  { %v1672_v34 = vpop.permute.xlu1 %1671 }
 0xa1d   :  { %v1683_v36 = vadd.f32 %v1672_v34, %v1659_v33 }
 0xa1f   :  { %1691 = vrot.lane.b32.xlu1 %v1683_v36, %s2352_s10 }
 0xa20   :  { %v1676_v4 = vpop.permute.xlu1 %1675 }
 0xa21   :  { %v1685_v43 = vadd.f32 %v1676_v4, %v1661_v40 }
 0xa22   :  { %v1674_v12 = vpop.permute.xlu0 %1673 }
 0xa23   :  { %v1684_v45 = vadd.f32 %v1674_v12, %v1660_v41  ;;  %1695 = vrot.lane.b32.xlu1 %v1685_v43, %s2352_s10 }
 0xa25   :  { %1693 = vrot.lane.b32.xlu0 %v1684_v45, %s2352_s10 }
 0xa26   :  { %v1678_v47 = vpop.permute.xlu0 %1677 }
 0xa27   :  { %v1686_v13 = vadd.f32 %v1678_v47, %v1662_v46 }
 0xa29   :  { %1697 = vrot.lane.b32.xlu0 %v1686_v13, %s2352_s10 }
 0xa91   :  { %v1692_v48 = vpop.permute.xlu1 %1691 }
 0xa92   :  { %1703 = vst.msk [vmem:[#allocation14] sm:$0xff] %vm518_vm2, %v1692_v48 }
 0xa95   :  { %v1696_v49 = vpop.permute.xlu1 %1695 }
 0xa96   :  { %1705 = vst.msk [vmem:[#allocation14 + $0x10] sm:$0xff] %vm518_vm2, %v1696_v49 }
 0xa97   :  { %v1694_v17 = vpop.permute.xlu0 %1693 }
 0xa98   :  { %1704 = vst.msk [vmem:[#allocation14 + $0x8] sm:$0xff] %vm518_vm2, %v1694_v17 }
 0xa9b   :  { %v1698_v5 = vpop.permute.xlu0 %1697 }
 0xa9c   :  { %1706 = vst.msk [vmem:[#allocation14 + $0x18] sm:$0xff] %vm518_vm2, %v1698_v5 }
 0xa9d   :  { %2317 = shalt.err (!%p2314_p4)
}
 0xa9e   :  { %s2318_s30 = scalar_lea.hbm %s3039_s19, 512 }
 0xa9f   :  { %p2319_p5 = scmp.ne.s32.totalorder %s3039_s19, %s2318_s30  ;;  %p2322_p6 = scmp.lt.u32.totalorder %s2318_s30, %s3039_s19 }
 0xaa1   :  { %p2324_p7 = pnand %p2322_p6, %p2319_p5 }
 0xaa3   :  { %2327 = shalt.err (!%p2324_p7)
}
 0xaa4   :  { %1718 = dma.vmem_to_hbm [thread:$0]  %s1713_s24, 512, %s3039_s19, [#allocation4], %s2342_s11, %s2342_s11, %s2343_s26  }
 0xaa5   :  { %2336 = dma.done.wait [#allocation4], 512  }
 0xaa6   :  { %2337 = vsyncadd [#allocation4], 4294966784 }
 0xaa7   :  { %1722 = vsyncpa [#allocation3], 1 }
 0xaa8   :  { %1723 = vsyncpa [#allocation6], 1 }
 0xaa9   :  { %1724 = vsyncpa [#allocation9], 1 }
 0xaaa   :  { %1725 = vsyncpa [#allocation12], 1 }
 0xaab   :  { %1726 = vsyncpa [#allocation4], 1 }

</bundles_post_ra>
